<compile_context>
chip_gen: v7x
topology: tpu7x:2x2x1
jax: 0.10.0
libtpu: 0.0.40
codegen_flags: <defaults>
</compile_context>

<pallas_src>
import functools

import jax
import jax.numpy as jnp
from jax.experimental import pallas as pl
from jax.experimental.pallas import tpu as pltpu


def _round_up(x, m):
    return ((x + m - 1) // m) * m


def _vq_kernel(x_ref, cbsq_ref, cb_ref, xq_ref, code_ref, err_ref, *, dist_bf16):
    """One (tm, D) row tile against the resident (K, D) codebook.

    x_ref:    (tm, D)  f32 packed input rows
    cbsq_ref: (1, K)   f32 0.5 * ||c||^2 (precomputed once in the wrapper)
    cb_ref:   (K, D)   f32 codebook (weight[:-1]), resident across the grid
    xq_ref:   (tm, D)  f32 quantized rows
    code_ref: (tm, 1)  int32 nearest-code ids
    err_ref:  (tm, 1)  f32 per-row sum of squared error (exact f32)
    """
    x = x_ref[...]                                        # (tm, D)
    cb = cb_ref[...]                                      # (K, D)
    K = cb.shape[0]

    # Distance matmul on the MXU.  bf16 operands (f32 accumulate) by default;
    # only the argmin consumes these scores, so output vectors are unaffected
    # (near-ties may resolve to a different, equally-close code).
    if dist_bf16:
        xm, cm = x.astype(jnp.bfloat16), cb.astype(jnp.bfloat16)
    else:
        xm, cm = x, cb
    # x . c^T without materializing a codebook transpose (contract dim 1 of both).
    cross = jax.lax.dot_general(
        xm, cm, dimension_numbers=(((1,), (1,)), ((), ())),
        preferred_element_type=jnp.float32)               # (tm, K)

    # argmin(||x||^2 + ||c||^2 - 2 x.c) == argmin(0.5*||c||^2 - x.c):
    # the row-constant ||x||^2 and the positive scale do not change the argmin.
    score = cbsq_ref[...] - cross                         # (tm, K)

    # Two plain lane reductions instead of a fused value+index argmin
    # (first-index tie-breaking preserved).
    min_score = jnp.min(score, axis=-1, keepdims=True)    # (tm, 1)
    iota_k = jax.lax.broadcasted_iota(jnp.int32, score.shape, 1)
    codes = jnp.min(jnp.where(score == min_score, iota_k, K), axis=-1)  # (tm,)

    # Embedding gather as one-hot @ codebook on the MXU (f32).
    onehot = (iota_k == codes[:, None]).astype(jnp.float32)             # (tm, K)
    xq = jnp.dot(onehot, cb, preferred_element_type=jnp.float32)        # (tm, D)
    xq_ref[...] = xq.astype(xq_ref.dtype)

    # Code ids stored directly as a (tm, 1) column: ~tm/8 masked vst per tile,
    # trivial next to the xq store, and it removes the M=1 MXU weight-load
    # matmul the previous lane-dense layout needed.  (v5e note: single vst
    # slot, but these stores co-issue with MXU pushes; MXU remains binding.)
    code_ref[...] = codes[:, None].astype(jnp.int32)

    # Exact f32 per-row commitment error; padded rows are simply never read
    # back by the wrapper, so no validity mask / scalar prefetch is needed.
    diff = xq - x
    err_ref[...] = jnp.sum(diff * diff, axis=-1, keepdims=True)


def _vq_quantize_all(x_all, codebook, cb_sq_half, *, tm, dist_bf16):
    """x_all: (Mp, D) f32 packed rows; codebook: (K, D) f32; cb_sq_half: (1, K)."""
    Mp, D = x_all.shape
    K = codebook.shape[0]
    assert Mp % tm == 0 and tm % 8 == 0
    num_tiles = Mp // tm

    xq, codes, err = pl.pallas_call(
        functools.partial(_vq_kernel, dist_bf16=dist_bf16),
        out_shape=(
            jax.ShapeDtypeStruct((Mp, D), jnp.float32),
            jax.ShapeDtypeStruct((Mp, 1), jnp.int32),
            jax.ShapeDtypeStruct((Mp, 1), jnp.float32),
        ),
        grid_spec=pltpu.PrefetchScalarGridSpec(
            num_scalar_prefetch=0,
            grid=(num_tiles,),
            in_specs=[
                pl.BlockSpec((tm, D), lambda i: (i, 0)),   # row tile
                pl.BlockSpec((1, K), lambda i: (0, 0)),    # 0.5*||c||^2 (resident)
                pl.BlockSpec((K, D), lambda i: (0, 0)),    # codebook (resident)
            ],
            out_specs=[
                pl.BlockSpec((tm, D), lambda i: (i, 0)),
                pl.BlockSpec((tm, 1), lambda i: (i, 0)),
                pl.BlockSpec((tm, 1), lambda i: (i, 0)),
            ],
        ),
        compiler_params=pltpu.CompilerParams(
            dimension_semantics=("parallel",),
            # Footprint at tm=1024, K=256 is a few MiB (blocks + score/one-hot
            # intermediates); 32 MiB is safe on v5e/v6e (128 MiB VMEM) and on
            # v7x (64 MiB physical VMEM).
            vmem_limit_bytes=32 * 1024 * 1024,
        ),
    )(x_all, cb_sq_half, codebook)

    return xq, codes.reshape(Mp), err.reshape(Mp)


def _choose_tm(total_rows, tm_max):
    # At least 2 grid steps when there is enough work (feeds both v7x
    # TensorCores / megacore halves and restores DMA/compute pipelining);
    # the tile grows up to tm_max for large batches to amortize the
    # ~0.35us per-grid-step overhead.
    if total_rows <= 8:
        return 8
    return min(tm_max, _round_up(-(-total_rows // 2), 8))


def vector_quantize2_forward(x_list, weight, beta=0.25, *, tm_max=1024,
                             dist_bf16=True):
    """Forward of VectorQuantize2 (eval mode: no EMA buffer updates).

    x_list: list of arrays with trailing dim D = codebook_dim.
    weight: (K+1, D) codebook embedding weight (last row is the padding row).
    Returns (x_q_list, loss, (None, None, x_code_list)).
    """
    return _vq2_forward_impl(tuple(x_list), weight, beta=float(beta),
                             tm_max=int(tm_max), dist_bf16=bool(dist_bf16))


@functools.partial(jax.jit, static_argnames=("beta", "tm_max", "dist_bf16"))
def _vq2_forward_impl(x_tuple, weight, *, beta, tm_max, dist_bf16):
    codebook = weight[:-1].astype(jnp.float32)            # weight[:-1, :] as in the module
    K, D = codebook.shape
    cb_sq_half = (0.5 * jnp.sum(codebook * codebook, axis=-1))[None, :]   # (1, K)

    # Dense packing: flatten every element, pad only to the 8-row sublane
    # boundary, concatenate -> one pallas_call over the whole batch.
    parts, metas = [], []            # metas: (row offset, valid rows, shape)
    off = 0
    for x in x_tuple:
        assert x.shape[-1] == D, "trailing dim must equal codebook_dim"
        m = 1
        for s in x.shape[:-1]:
            m *= s
        metas.append((off, m, x.shape))
        if m == 0:
            continue
        m8 = _round_up(m, 8)
        xf = x.reshape(m, D).astype(jnp.float32)
        if m8 != m:
            xf = jnp.pad(xf, ((0, m8 - m), (0, 0)))
        parts.append(xf)
        off += m8

    total_rows = off
    n_elems = len(x_tuple)

    if total_rows == 0:
        # Degenerate: every element is empty.
        x_q_list = [x.astype(jnp.float32) for x in x_tuple]
        x_code_list = [jnp.zeros(x.shape[:-1], jnp.int32) for x in x_tuple]
        return x_q_list, jnp.float32(0.0), (None, None, x_code_list)

    tm = _choose_tm(total_rows, tm_max)
    Mp = _round_up(total_rows, tm)
    if Mp != total_rows:
        parts.append(jnp.zeros((Mp - total_rows, D), jnp.float32))
    x_all = parts[0] if len(parts) == 1 else jnp.concatenate(parts, axis=0)

    xq_all, codes_all, err_all = _vq_quantize_all(
        x_all, codebook, cb_sq_half, tm=tm, dist_bf16=dist_bf16)

    x_q_list, x_code_list = [], []
    loss = jnp.float32(0.0)
    for (offset, m, shape) in metas:
        if m == 0:
            # Empty element: emit empty outputs, contribute 0 to the loss
            # (the PyTorch reference would produce NaN here).
            x_q_list.append(jnp.zeros(shape, jnp.float32))
            x_code_list.append(jnp.zeros(shape[:-1], jnp.int32))
            continue
        xq_i = xq_all[offset:offset + m]
        codes_i = codes_all[offset:offset + m]
        err_i = jnp.sum(err_all[offset:offset + m])
        mse_i = err_i / jnp.float32(m * D)
        # beta * mean((sg(x_q)-x)^2) + mean((x_q-sg(x))^2): identical values fwd.
        loss = loss + beta * mse_i + mse_i
        # Straight-through x + sg(x_q - x) is value-identical to x_q forward.
        # TODO(synk): training-mode EMA buffer updates / unused-code restarts
        # and the STE gradient plumbing are stateful/backward concerns and are
        # not part of this inference kernel.
        x_q_list.append(xq_i.reshape(shape))
        x_code_list.append(codes_i.reshape(shape[:-1]))

    loss = loss / jnp.float32(n_elems)
    return x_q_list, loss, (None, None, x_code_list)


def _reference_forward(x_list, weight, beta=0.25):
    codebook = weight[:-1]
    x_q_list, code_list = [], []
    loss = jnp.float32(0.0)
    for x in x_list:
        D = x.shape[-1]
        xf = x.reshape(-1, D).astype(jnp.float32)
        dist = (jnp.sum(xf * xf, axis=-1, keepdims=True)
                + jnp.sum(codebook * codebook, axis=-1)[None, :]
                - 2.0 * xf @ codebook.T)
        codes = jnp.argmin(dist, axis=-1)
        xq = codebook[codes]
        mse = jnp.mean((xq - xf) ** 2)
        loss = loss + beta * mse + mse
        x_q_list.append(xq.reshape(x.shape))
        code_list.append(codes.reshape(x.shape[:-1]))
    return x_q_list, loss / len(x_list), code_list


if __name__ == "__main__":
    key = jax.random.PRNGKey(0)
    codebook_size, codebook_dim = 256, 32          # K, D
    k_w, k_x0, k_x1 = jax.random.split(key, 3)

    # nn.Embedding(K+1, D) weight, then .uniform_(-1/K, 1/K)
    weight = jax.random.uniform(
        k_w, (codebook_size + 1, codebook_dim), jnp.float32,
        minval=-1.0 / codebook_size, maxval=1.0 / codebook_size)

    # x_list: two items with different leading shapes, trailing dim = D.
    x_list = [
        jax.random.normal(k_x0, (8, 16, codebook_dim), jnp.float32) * 0.01,
        jax.random.normal(k_x1, (128, codebook_dim), jnp.float32) * 0.01,
    ]

    ref_q, ref_loss, ref_codes = _reference_forward(x_list, weight, beta=0.25)

    # 1) Bit-faithful path (f32 distances): exact code match vs pure-JAX ref.
    q_f32, loss_f32, (_, _, codes_f32) = vector_quantize2_forward(
        x_list, weight, beta=0.25, dist_bf16=False)
    jax.block_until_ready(loss_f32)
    for a, b in zip(q_f32, ref_q):
        assert jnp.allclose(a, b, atol=1e-5), "quantized output mismatch (f32)"
    for a, b in zip(codes_f32, ref_codes):
        assert jnp.array_equal(a, b), "code index mismatch (f32)"
    assert jnp.allclose(loss_f32, ref_loss, atol=1e-6, rtol=1e-5), "loss mismatch (f32)"

    # 2) Default performance path (bf16 distance matmul, f32 accumulate):
    #    near-ties may pick a different (equally close) code, so check
    #    self-consistency and the loss at a loose tolerance instead.
    x_q_list, loss, (_, _, x_code_list) = vector_quantize2_forward(
        x_list, weight, beta=0.25)
    jax.block_until_ready(x_q_list)
    jax.block_until_ready(loss)
    jax.block_until_ready(x_code_list)
    codebook = weight[:-1]
    for xq, c in zip(x_q_list, x_code_list):
        assert bool(jnp.all((c >= 0) & (c < codebook_size))), "code out of range"
        assert jnp.allclose(xq, codebook[c], atol=1e-4), "x_q != codebook[code]"
    assert bool(jnp.isfinite(loss)), "non-finite loss"
    assert jnp.allclose(loss, ref_loss, rtol=2e-2, atol=1e-7), "loss far from reference"

    print("KERNEL_OK")
</pallas_src>

<mosaic_0001>
module attributes {stable_mosaic.version = 11 : i64} {
  func.func @_vq_kernel(%arg0: i32, %arg1: memref<128x32xf32, #tpu.memory_space<vmem>>, %arg2: memref<1x256xf32, #tpu.memory_space<vmem>>, %arg3: memref<256x32xf32, #tpu.memory_space<vmem>>, %arg4: memref<128x32xf32, #tpu.memory_space<vmem>>, %arg5: memref<128x1xi32, #tpu.memory_space<vmem>>, %arg6: memref<128x1xf32, #tpu.memory_space<vmem>>) attributes {dimension_semantics = [#tpu.dimension_semantics<parallel>], iteration_bounds = array<i64: 2>, scalar_prefetch = 0 : i64, scratch_operands = 0 : i64, tpu.core_type = #tpu.core_type<tc>, window_params = [{transform_indices = @transform_0, window_bounds = array<i64: 128, 32>}, {pipeline_mode = #tpu.pipeline_mode<synchronous>, transform_indices = @transform_1, window_bounds = array<i64: 1, 256>}, {pipeline_mode = #tpu.pipeline_mode<synchronous>, transform_indices = @transform_2, window_bounds = array<i64: 256, 32>}, {transform_indices = @transform_3, window_bounds = array<i64: 128, 32>}, {transform_indices = @transform_4, window_bounds = array<i64: 128, 1>}, {transform_indices = @transform_5, window_bounds = array<i64: 128, 1>}]} {
    %c0 = arith.constant 0 : index
    %c0_0 = arith.constant 0 : index
    %0 = vector.load %arg1[%c0, %c0_0] : memref<128x32xf32, #tpu.memory_space<vmem>>, vector<128x32xf32>
    %c0_1 = arith.constant 0 : index
    %c0_2 = arith.constant 0 : index
    %1 = vector.load %arg3[%c0_1, %c0_2] : memref<256x32xf32, #tpu.memory_space<vmem>>, vector<256x32xf32>
    %cst = arith.constant dense<0.000000e+00> : vector<128x256xf32>
    %2 = tpu.matmul %0, %1, %cst {dimension_numbers = #tpu.dot_dimension_numbers<[1], [1], [0], [0], [0, 0, 1, 0], [], []>} : vector<128x32xf32>, vector<256x32xf32>, vector<128x256xf32> -> vector<128x256xf32>
    %c0_3 = arith.constant 0 : index
    %c0_4 = arith.constant 0 : index
    %3 = vector.load %arg2[%c0_3, %c0_4] : memref<1x256xf32, #tpu.memory_space<vmem>>, vector<1x256xf32>
    %4 = vector.broadcast %3 : vector<1x256xf32> to vector<128x256xf32>
    %5 = arith.subf %4, %2 : vector<128x256xf32>
    %cst_5 = arith.constant dense<0x7F800000> : vector<128xf32>
    %6 = vector.multi_reduction <minimumf>, %5, %cst_5 [1] : vector<128x256xf32> to vector<128xf32>
    %7 = vector.shape_cast %6 : vector<128xf32> to vector<128x1xf32>
    %8 = tpu.iota {dimensions = array<i32: 1>} : vector<128x256xi32>
    %9 = vector.broadcast %7 : vector<128x1xf32> to vector<128x256xf32>
    %10 = arith.cmpf oeq, %5, %9 : vector<128x256xf32>
    %c256_i32 = arith.constant 256 : i32
    %11 = vector.broadcast %c256_i32 : i32 to vector<128x256xi32>
    %12 = arith.select %10, %8, %11 : vector<128x256xi1>, vector<128x256xi32>
    %cst_6 = arith.constant dense<2147483647> : vector<128xi32>
    %13 = vector.multi_reduction <minsi>, %12, %cst_6 [1] : vector<128x256xi32> to vector<128xi32>
    %14 = vector.shape_cast %13 : vector<128xi32> to vector<128x1xi32>
    %15 = vector.broadcast %14 : vector<128x1xi32> to vector<128x256xi32>
    %16 = arith.cmpi eq, %8, %15 : vector<128x256xi32>
    %17 = arith.extui %16 : vector<128x256xi1> to vector<128x256xi32>
    %18 = arith.sitofp %17 : vector<128x256xi32> to vector<128x256xf32>
    %cst_7 = arith.constant dense<0.000000e+00> : vector<128x32xf32>
    %19 = tpu.matmul %18, %1, %cst_7 {dimension_numbers = #tpu.dot_dimension_numbers<[1], [0], [0], [1], [0, 0, 1, 1], [], []>} : vector<128x256xf32>, vector<256x32xf32>, vector<128x32xf32> -> vector<128x32xf32>
    %c0_8 = arith.constant 0 : index
    %c0_9 = arith.constant 0 : index
    %20 = vector.load %arg4[%c0_8, %c0_9] : memref<128x32xf32, #tpu.memory_space<vmem>>, vector<128x32xf32>
    tpu.vector_store %arg4[%c0_8, %c0_9], %19 {strides = array<i32>} : memref<128x32xf32, #tpu.memory_space<vmem>>, vector<128x32xf32>,
    %21 = vector.shape_cast %13 : vector<128xi32> to vector<128x1xi32>
    %c0_10 = arith.constant 0 : index
    %c0_11 = arith.constant 0 : index
    %22 = vector.load %arg5[%c0_10, %c0_11] : memref<128x1xi32, #tpu.memory_space<vmem>>, vector<128x1xi32>
    tpu.vector_store %arg5[%c0_10, %c0_11], %21 {strides = array<i32>} : memref<128x1xi32, #tpu.memory_space<vmem>>, vector<128x1xi32>,
    %23 = arith.subf %19, %0 : vector<128x32xf32>
    %24 = arith.mulf %23, %23 : vector<128x32xf32>
    %cst_12 = arith.constant dense<0.000000e+00> : vector<128xf32>
    %25 = vector.multi_reduction <add>, %24, %cst_12 [1] : vector<128x32xf32> to vector<128xf32>
    %26 = vector.shape_cast %25 : vector<128xf32> to vector<128x1xf32>
    %c0_13 = arith.constant 0 : index
    %c0_14 = arith.constant 0 : index
    %27 = vector.load %arg6[%c0_13, %c0_14] : memref<128x1xf32, #tpu.memory_space<vmem>>, vector<128x1xf32>
    tpu.vector_store %arg6[%c0_13, %c0_14], %26 {strides = array<i32>} : memref<128x1xf32, #tpu.memory_space<vmem>>, vector<128x1xf32>,
    return
  }
  func.func @transform_0(%arg0: i32) -> (i32, i32) {
    %c0_i32 = arith.constant 0 : i32
    %c0_i32_0 = arith.constant 0 : i32
    return %arg0, %c0_i32 : i32, i32
  }
  func.func @transform_1(%arg0: i32) -> (i32, i32) {
    %c0_i32 = arith.constant 0 : i32
    %c0_i32_0 = arith.constant 0 : i32
    %c0_i32_1 = arith.constant 0 : i32
    return %c0_i32, %c0_i32_0 : i32, i32
  }
  func.func @transform_2(%arg0: i32) -> (i32, i32) {
    %c0_i32 = arith.constant 0 : i32
    %c0_i32_0 = arith.constant 0 : i32
    %c0_i32_1 = arith.constant 0 : i32
    return %c0_i32, %c0_i32_0 : i32, i32
  }
  func.func @transform_3(%arg0: i32) -> (i32, i32) {
    %c0_i32 = arith.constant 0 : i32
    %c0_i32_0 = arith.constant 0 : i32
    return %arg0, %c0_i32 : i32, i32
  }
  func.func @transform_4(%arg0: i32) -> (i32, i32) {
    %c0_i32 = arith.constant 0 : i32
    %c0_i32_0 = arith.constant 0 : i32
    return %arg0, %c0_i32 : i32, i32
  }
  func.func @transform_5(%arg0: i32) -> (i32, i32) {
    %c0_i32 = arith.constant 0 : i32
    %c0_i32_0 = arith.constant 0 : i32
    return %arg0, %c0_i32 : i32, i32
  }
}

</mosaic_0001>

<bundles_post_ra>
// kernel: _vq2_forward_impl.1
= control target key start
LH: loop header
LB: loop body
LE: loop exit
PB: predicated region body
PF: predicated region fallthrough
CT: control target
= control target key end

     0   :  { %s1933_s18 = smov 0   ;;  %s2742_s0 = inlined_call_operand.vmem [shape: f32[256,32], index: 0, kind: input, shape index: {}]   ;;  %s2743_s1 = inlined_call_operand.vmem [shape: f32[1,256], index: 1, kind: input, shape index: {}]   ;;  %s2744_s2 = inlined_call_operand.vmem [shape: f32[256,32], index: 2, kind: input, shape index: {}]   ;;  %s2745_s3 = inlined_call_operand.vmem [shape: f32[256,32], index: 3, kind: output, shape index: {0}]   ;;  %s2746_s4 = inlined_call_operand.vmem [shape: s32[256,1], index: 4, kind: output, shape index: {1}]   ;;  %s2747_s5 = inlined_call_operand.vmem [shape: f32[256,1], index: 5, kind: output, shape index: {2}]  }
   0x1 LB: > { %s1518_s19 = sadd.s32 4294967295, %s1900_s18   ;;  %p1522_p0 = scmp.ge.s32.totalorder %s1900_s18, 1  ;;  %s1900_s18 = sphi %s1933_s18, %s16_s18  }
   0x2   : > { %p193_p1 = scmp.lt.s32.totalorder %s1900_s18, 3 }
   0x4   : > { %p194_p2 = pnand %p1522_p0, %p193_p1 }
   0x5   : > { %v287_v0 = vld [vmem:[%s2744_s2 + $0x80] sm:$0xff] (!%p194_p2)  ;;  %v288_v1 = vld [vmem:[%s2744_s2 + $0x88] sm:$0xff] (!%p194_p2)  ;;  %vm303_vm0 = vcmask (!%p194_p2), 261120   ;;  %s1523_s26 = sshll.u32 (!%p194_p2), %s1518_s19, 4  ;;  %v289_v6 = vld [vmem:[%s2744_s2 + $0x90] sm:$0xff] (!%p194_p2) }
   0x6   : > { %197 = sbr.rel (%p194_p2) target bundleno = 1154 (0x482), region = 32  ;;  %v271_v2 = vld [vmem:[%s2744_s2] sm:$0xff] (!%p194_p2)  ;;  %v1789_v3 = vpack.c.bf16 (!%p194_p2), %v288_v1, %v287_v0  ;;  %vm1952_vm1 = vmpackc.low (!%p194_p2), %vm303_vm0, %vm303_vm0  ;;  %v272_v5 = vld [vmem:[%s2744_s2 + $0x8] sm:$0xff] (!%p194_p2)  ;;  %p232_p3 = scmp.lt.s32.totalorder (!%p194_p2), %s1523_s26, 31  ;;  %v611_v1 = vlaneseq (!%p194_p2) }
   0x7   : > { %v1792_v7 = vpack.c.bf16 (!%p194_p2), %v272_v5, %v271_v2  ;;  %v290_v8 = vld [vmem:[%s2744_s2 + $0x98] sm:$0xff] (!%p194_p2)  ;;  %v273_v10 = vld [vmem:[%s2744_s2 + $0x10] sm:$0xff] (!%p194_p2)  ;;  %v291_v12 = vld [vmem:[%s2744_s2 + $0xa0] sm:$0xff] (!%p194_p2) }
   0x8   : > { %1791 = vmatprep.subr.msk.bf16.mxu0 (!%p194_p2), %vm1952_vm1, %v1789_v3  ;;  %v1795_v9 = vpack.c.bf16 (!%p194_p2), %v290_v8, %v289_v6  ;;  %v274_v11 = vld [vmem:[%s2744_s2 + $0x18] sm:$0xff] (!%p194_p2)  ;;  %1838 = vmatprep.subr.bf16.mxu1 (!%p194_p2), %v1789_v3  ;;  %v292_v13 = vld [vmem:[%s2744_s2 + $0xa8] sm:$0xff] (!%p194_p2)  ;;  %v275_v16 = vld [vmem:[%s2744_s2 + $0x20] sm:$0xff] (!%p194_p2)  ;;  %v612_v2 = vshrl.u32 (!%p194_p2), %v611_v1, 7 }
   0x9   : > { %1794 = vmatpush3.bf16.xpose.msk.msra.mxu0 (!%p194_p2), %vm1952_vm1, %v1792_v7  ;;  %1840 = vmatpush3.bf16.msra.mxu1 (!%p194_p2), %v1792_v7  ;;  %v1798_v14 = vpack.c.bf16 (!%p194_p2), %v274_v11, %v273_v10  ;;  %v1801_v15 = vpack.c.bf16 (!%p194_p2), %v292_v13, %v291_v12  ;;  %v276_v17 = vld [vmem:[%s2744_s2 + $0x28] sm:$0xff] (!%p194_p2)  ;;  %v293_v18 = vld [vmem:[%s2744_s2 + $0xb0] sm:$0xff] (!%p194_p2)  ;;  %v294_v19 = vld [vmem:[%s2744_s2 + $0xb8] sm:$0xff] (!%p194_p2) }
   0xa   : > { %1797 = vmatprep.subr.msk.bf16.mxu0 (!%p194_p2), %vm1952_vm1, %v1795_v9  ;;  %1842 = vmatprep.subr.bf16.mxu1 (!%p194_p2), %v1795_v9  ;;  %v1804_v20 = vpack.c.bf16 (!%p194_p2), %v276_v17, %v275_v16  ;;  %v1807_v22 = vpack.c.bf16 (!%p194_p2), %v294_v19, %v293_v18  ;;  %v277_v23 = vld [vmem:[%s2744_s2 + $0x30] sm:$0xff] (!%p194_p2)  ;;  %v278_v24 = vld [vmem:[%s2744_s2 + $0x38] sm:$0xff] (!%p194_p2)  ;;  %v295_v25 = vld [vmem:[%s2744_s2 + $0xc0] sm:$0xff] (!%p194_p2)  ;;  %v613_v3 = vsub.s32 (!%p194_p2), 0, %v612_v2  ;;  %v617_v5 = vsub.s32 (!%p194_p2), 1, %v612_v2 }
   0xb   : > { %v296_v26 = vld [vmem:[%s2744_s2 + $0xc8] sm:$0xff] (!%p194_p2)  ;;  %v1810_v27 = vpack.c.bf16 (!%p194_p2), %v278_v24, %v277_v23  ;;  %v279_v29 = vld [vmem:[%s2744_s2 + $0x40] sm:$0xff] (!%p194_p2)  ;;  %v297_v31 = vld [vmem:[%s2744_s2 + $0xd0] sm:$0xff] (!%p194_p2) }
   0xc   : > { %v1813_v28 = vpack.c.bf16 (!%p194_p2), %v296_v26, %v295_v25  ;;  %v280_v30 = vld [vmem:[%s2744_s2 + $0x48] sm:$0xff] (!%p194_p2)  ;;  %v298_v32 = vld [vmem:[%s2744_s2 + $0xd8] sm:$0xff] (!%p194_p2)  ;;  %v281_v35 = vld [vmem:[%s2744_s2 + $0x50] sm:$0xff] (!%p194_p2) }
   0xd   : > { %s2751_s26 = smov (!%p232_p3, %s1523_s26), 31  ;;  %1844 = vmatpush3.bf16.msra.mxu1 %v1798_v14  ;;  %v1816_v33 = vpack.c.bf16 %v280_v30, %v279_v29  ;;  %v1819_v34 = vpack.c.bf16 %v298_v32, %v297_v31  ;;  %v282_v36 = vld [vmem:[%s2744_s2 + $0x58] sm:$0xff]  ;;  %v299_v37 = vld [vmem:[%s2744_s2 + $0xe0] sm:$0xff]  ;;  %v300_v38 = vld [vmem:[%s2744_s2 + $0xe8] sm:$0xff] }
   0xe   : > { %s1983_s16 = sshll.u32 %s2751_s26, 3  ;;  %1846 = vmatprep.subr.bf16.mxu1 %v1801_v15  ;;  %v1822_v39 = vpack.c.bf16 %v282_v36, %v281_v35  ;;  %v1825_v40 = vpack.c.bf16 %v300_v38, %v299_v37  ;;  %v283_v41 = vld [vmem:[%s2744_s2 + $0x60] sm:$0xff]  ;;  %v284_v42 = vld [vmem:[%s2744_s2 + $0x68] sm:$0xff]  ;;  %v301_v43 = vld [vmem:[%s2744_s2 + $0xf0] sm:$0xff] }
   0xf   : > { %s1995_s24 = scalar_lea.vmem %s2742_s0, %s1983_s16  ;;  %v302_v44 = vld [vmem:[%s2744_s2 + $0xf8] sm:$0xff]  ;;  %v1828_v45 = vpack.c.bf16 %v284_v42, %v283_v41  ;;  %v285_v47 = vld [vmem:[%s2744_s2 + $0x70] sm:$0xff]  ;;  %v609_v4 = vld [vmem:[%s2743_s1] sm:$0x3]  ;;  %s2519_s25 = scalar_lea.vmem %s2746_s4, %s1983_s16 }
  0x10   : > { %v255_v21 = vld [vmem:[%s1995_s24] sm:$0xff]  ;;  %v1831_v46 = vpack.c.bf16 %v302_v44, %v301_v43  ;;  %v286_v48 = vld [vmem:[%s2744_s2 + $0x78] sm:$0xff]  ;;  %v256_v50 = vld [vmem:[%s1995_s24 + $0x8] sm:$0xff]  ;;  %v2135_v6 = vrot.slane %v609_v4, %v613_v3  ;;  %v2137_v7 = vrot.slane %v609_v4, %v617_v5  ;;  %s2635_s28 = scalar_lea.vmem %s2745_s3, %s1983_s16  ;;  %s2705_s6 = scalar_lea.vmem %s2747_s5, %s1983_s16 }
  0x11   : > { %1800 = vmatpush3.bf16.xpose.msk.msra.mxu0 %vm1952_vm1, %v1798_v14  ;;  %1677 = vmatprep.mubr.msk.f32.mxu0 %vm303_vm0, %v255_v21  ;;  %v1834_v49 = vpack.c.bf16 %v286_v48, %v285_v47  ;;  %v257_v51 = vld [vmem:[%s1995_s24 + $0x10] sm:$0xff]  ;;  %v258_v52 = vld [vmem:[%s1995_s24 + $0x18] sm:$0xff]  ;;  %v259_v53 = vld [vmem:[%s1995_s24 + $0x20] sm:$0xff] }
  0x12   : > { %1803 = vmatprep.subr.msk.bf16.mxu0 %vm1952_vm1, %v1801_v15  ;;  %1848 = vmatpush3.bf16.msra.mxu1 %v1804_v20  ;;  %v260_v54 = vld [vmem:[%s1995_s24 + $0x28] sm:$0xff]  ;;  %v261_v55 = vld [vmem:[%s1995_s24 + $0x30] sm:$0xff]  ;;  %v262_v56 = vld [vmem:[%s1995_s24 + $0x38] sm:$0xff] }
  0x13   : > { %1850 = vmatprep.subr.bf16.mxu1 %v1807_v22  ;;  %v263_v57 = vld [vmem:[%s1995_s24 + $0x40] sm:$0xff]  ;;  %v264_v58 = vld [vmem:[%s1995_s24 + $0x48] sm:$0xff]  ;;  %v265_v59 = vld [vmem:[%s1995_s24 + $0x50] sm:$0xff] }
  0x14   : > { %v266_v60 = vld [vmem:[%s1995_s24 + $0x58] sm:$0xff]  ;;  %v267_v61 = vld [vmem:[%s1995_s24 + $0x60] sm:$0xff]  ;;  %v268_v62 = vld [vmem:[%s1995_s24 + $0x68] sm:$0xff] }
  0x15   : > { %v269_v63 = vld [vmem:[%s1995_s24 + $0x70] sm:$0xff]  ;;  %v270_v0 = vld [vmem:[%s1995_s24 + $0x78] sm:$0xff] }
  0x16   : > { %1852 = vmatpush3.bf16.msra.mxu1 %v1810_v27 }
  0x17   : > { %1854 = vmatprep.subr.bf16.mxu1 %v1813_v28 }
  0x19   : > { %1806 = vmatpush3.bf16.xpose.msk.msra.mxu0 %vm1952_vm1, %v1804_v20 }
  0x1a   : > { %1809 = vmatprep.subr.msk.bf16.mxu0 %vm1952_vm1, %v1807_v22  ;;  %1856 = vmatpush3.bf16.msra.mxu1 %v1816_v33 }
  0x1b   : > { %1858 = vmatprep.subr.bf16.mxu1 %v1819_v34 }
  0x1e   : > { %1860 = vmatpush3.bf16.msra.mxu1 %v1822_v39 }
  0x1f   : > { %1862 = vmatprep.subr.bf16.mxu1 %v1825_v40 }
  0x21   : > { %1812 = vmatpush3.bf16.xpose.msk.msra.mxu0 %vm1952_vm1, %v1810_v27 }
  0x22   : > { %1815 = vmatprep.subr.msk.bf16.mxu0 %vm1952_vm1, %v1813_v28  ;;  %1864 = vmatpush3.bf16.msra.mxu1 %v1828_v45 }
  0x23   : > { %1866 = vmatprep.subr.bf16.mxu1 %v1831_v46 }
  0x26   : > { %1868 = vmatpush3.bf16.msra.mxu1 %v1834_v49 }
  0x29   : > { %1818 = vmatpush3.bf16.xpose.msk.msra.mxu0 %vm1952_vm1, %v1816_v33 }
  0x2a   : > { %1821 = vmatprep.subr.msk.bf16.mxu0 %vm1952_vm1, %v1819_v34 }
  0x31   : > { %1824 = vmatpush3.bf16.xpose.msk.msra.mxu0 %vm1952_vm1, %v1822_v39 }
  0x32   : > { %1827 = vmatprep.subr.msk.bf16.mxu0 %vm1952_vm1, %v1825_v40 }
  0x39   : > { %1830 = vmatpush3.bf16.xpose.msk.msra.mxu0 %vm1952_vm1, %v1828_v45 }
  0x3a   : > { %1833 = vmatprep.subr.msk.bf16.mxu0 %vm1952_vm1, %v1831_v46 }
  0x41   : > { %1836 = vmatpush3.bf16.xpose.msk.msra.mxu0 %vm1952_vm1, %v1834_v49 }
  0x48   : > { %1678 = vmatmul.mubr.msk.f32.vlgmr.msra.gmra.mrb[0].mxu0 %vm303_vm0, %v255_v21 }
  0x49   : > { %1679 = vmatprep.mubr.msk.f32.mxu0 %vm303_vm0, %v256_v50 }
  0x4c   : > { %1680 = vmatmul.mubr.msk.f32.gmra.mrb[2].mxu0 %vm303_vm0, %v256_v50 }
  0x4d   : > { %1681 = vmatprep.mubr.msk.f32.mxu0 %vm303_vm0, %v257_v51 }
  0x50   : > { %1682 = vmatmul.mubr.msk.f32.gmra.mrb[4].mxu0 %vm303_vm0, %v257_v51 }
  0x51   : > { %1683 = vmatprep.mubr.msk.f32.mxu0 %vm303_vm0, %v258_v52 }
  0x54   : > { %1684 = vmatmul.mubr.msk.f32.gmra.mrb[6].mxu0 %vm303_vm0, %v258_v52 }
  0x55   : > { %1685 = vmatprep.mubr.msk.f32.mxu0 %vm303_vm0, %v259_v53 }
  0x58   : > { %1686 = vmatmul.mubr.msk.f32.gmra.mrb[8].mxu0 %vm303_vm0, %v259_v53 }
  0x59   : > { %1687 = vmatprep.mubr.msk.f32.mxu0 %vm303_vm0, %v260_v54 }
  0x5c   : > { %1688 = vmatmul.mubr.msk.f32.gmra.mrb[10].mxu0 %vm303_vm0, %v260_v54 }
  0x5d   : > { %1689 = vmatprep.mubr.msk.f32.mxu0 %vm303_vm0, %v261_v55 }
  0x60   : > { %1690 = vmatmul.mubr.msk.f32.gmra.mrb[12].mxu0 %vm303_vm0, %v261_v55 }
  0x61   : > { %1691 = vmatprep.mubr.msk.f32.mxu0 %vm303_vm0, %v262_v56 }
  0x64   : > { %1692 = vmatmul.mubr.msk.f32.gmra.mrb[14].mxu0 %vm303_vm0, %v262_v56 }
  0x65   : > { %1693 = vmatprep.mubr.msk.f32.mxu0 %vm303_vm0, %v263_v57 }
  0x68   : > { %1694 = vmatmul.mubr.msk.f32.gmra.mrb[16].mxu0 %vm303_vm0, %v263_v57 }
  0x69   : > { %1695 = vmatprep.mubr.msk.f32.mxu0 %vm303_vm0, %v264_v58 }
  0x6c   : > { %1696 = vmatmul.mubr.msk.f32.gmra.mrb[18].mxu0 %vm303_vm0, %v264_v58 }
  0x6d   : > { %1697 = vmatprep.mubr.msk.f32.mxu0 %vm303_vm0, %v265_v59 }
  0x70   : > { %1698 = vmatmul.mubr.msk.f32.gmra.mrb[20].mxu0 %vm303_vm0, %v265_v59 }
  0x71   : > { %1699 = vmatprep.mubr.msk.f32.mxu0 %vm303_vm0, %v266_v60 }
  0x74   : > { %1700 = vmatmul.mubr.msk.f32.gmra.mrb[22].mxu0 %vm303_vm0, %v266_v60 }
  0x75   : > { %1701 = vmatprep.mubr.msk.f32.mxu0 %vm303_vm0, %v267_v61 }
  0x78   : > { %1702 = vmatmul.mubr.msk.f32.gmra.mrb[24].mxu0 %vm303_vm0, %v267_v61 }
  0x79   : > { %1703 = vmatprep.mubr.msk.f32.mxu0 %vm303_vm0, %v268_v62 }
  0x7c   : > { %1704 = vmatmul.mubr.msk.f32.gmra.mrb[26].mxu0 %vm303_vm0, %v268_v62 }
  0x7d   : > { %1705 = vmatprep.mubr.msk.f32.mxu0 %vm303_vm0, %v269_v63 }
  0x80   : > { %1706 = vmatmul.mubr.msk.f32.gmra.mrb[28].mxu0 %vm303_vm0, %v269_v63 }
  0x81   : > { %1707 = vmatprep.mubr.msk.f32.mxu0 %vm303_vm0, %v270_v0 }
  0x84   : > { %1708 = vmatmul.mubr.msk.f32.gmra.mrb[30].mxu0 %vm303_vm0, %v270_v0 }
 0x11b   : > { %v514_v8 = vpop.f32.mrb[0].mxu0 }
 0x11c   : > { %v2140_v9 = vsub.f32 %v2135_v6, %v514_v8  ;;  %v516_v10 = vpop.f32.mrb[1].mxu0 }
 0x11d   : > { %v2143_v11 = vsub.f32 %v2137_v7, %v516_v10 }
 0x11f   : > { %v520_v12 = vpop.f32.mrb[2].mxu0  ;;  %v653_v13 = vmin.f32 %v2140_v9, %v2143_v11 }
 0x120   : > { %v2148_v14 = vsub.f32 %v2135_v6, %v520_v12  ;;  %v522_v15 = vpop.f32.mrb[3].mxu0 }
 0x121   : > { %v2151_v16 = vsub.f32 %v2137_v7, %v522_v15  ;;  %654 = vmin.xlane.f32.xlu0 %v653_v13 }
 0x123   : > { %v526_v17 = vpop.f32.mrb[4].mxu0  ;;  %v656_v18 = vmin.f32 %v2148_v14, %v2151_v16 }
 0x124   : > { %v2156_v19 = vsub.f32 %v2135_v6, %v526_v17  ;;  %v528_v20 = vpop.f32.mrb[5].mxu0 }
 0x125   : > { %v2159_v21 = vsub.f32 %v2137_v7, %v528_v20  ;;  %657 = vmin.xlane.f32.xlu0 %v656_v18 }
 0x127   : > { %v532_v22 = vpop.f32.mrb[6].mxu0  ;;  %v659_v23 = vmin.f32 %v2156_v19, %v2159_v21 }
 0x128   : > { %v2164_v24 = vsub.f32 %v2135_v6, %v532_v22  ;;  %v534_v25 = vpop.f32.mrb[7].mxu0 }
 0x129   : > { %v2167_v26 = vsub.f32 %v2137_v7, %v534_v25  ;;  %660 = vmin.xlane.f32.xlu1 %v659_v23 }
 0x12b   : > { %v538_v27 = vpop.f32.mrb[8].mxu0  ;;  %v662_v28 = vmin.f32 %v2164_v24, %v2167_v26 }
 0x12c   : > { %v2172_v29 = vsub.f32 %v2135_v6, %v538_v27  ;;  %v540_v30 = vpop.f32.mrb[9].mxu0 }
 0x12d   : > { %v2175_v31 = vsub.f32 %v2137_v7, %v540_v30  ;;  %663 = vmin.xlane.f32.xlu1 %v662_v28 }
 0x12f   : > { %v544_v32 = vpop.f32.mrb[10].mxu0  ;;  %v665_v33 = vmin.f32 %v2172_v29, %v2175_v31 }
 0x130   : > { %v2180_v34 = vsub.f32 %v2135_v6, %v544_v32  ;;  %v546_v35 = vpop.f32.mrb[11].mxu0 }
 0x131   : > { %v2183_v36 = vsub.f32 %v2137_v7, %v546_v35  ;;  %666 = vmin.xlane.f32.xlu0 %v665_v33 }
 0x133   : > { %v550_v37 = vpop.f32.mrb[12].mxu0  ;;  %v668_v38 = vmin.f32 %v2180_v34, %v2183_v36 }
 0x134   : > { %v2188_v39 = vsub.f32 %v2135_v6, %v550_v37  ;;  %v552_v40 = vpop.f32.mrb[13].mxu0 }
 0x135   : > { %v2191_v41 = vsub.f32 %v2137_v7, %v552_v40  ;;  %669 = vmin.xlane.f32.xlu1 %v668_v38  ;;  %v2268_v40 = vand.u32 127, %v611_v1 }
 0x137   : > { %v556_v42 = vpop.f32.mrb[14].mxu0  ;;  %v671_v43 = vmin.f32 %v2188_v39, %v2191_v41 }
 0x138   : > { %v2196_v44 = vsub.f32 %v2135_v6, %v556_v42  ;;  %v558_v45 = vpop.f32.mrb[15].mxu0  ;;  %v2271_v42 = vadd.s32 128, %v2268_v40 }
 0x139   : > { %v2199_v46 = vsub.f32 %v2137_v7, %v558_v45  ;;  %672 = vmin.xlane.f32.xlu0 %v671_v43 }
 0x13b   : > { %v562_v47 = vpop.f32.mrb[16].mxu0  ;;  %v674_v48 = vmin.f32 %v2196_v44, %v2199_v46 }
 0x13c   : > { %v2204_v49 = vsub.f32 %v2135_v6, %v562_v47  ;;  %v564_v50 = vpop.f32.mrb[17].mxu0 }
 0x13d   : > { %v2207_v51 = vsub.f32 %v2137_v7, %v564_v50  ;;  %675 = vmin.xlane.f32.xlu1 %v674_v48 }
 0x13f   : > { %v568_v52 = vpop.f32.mrb[18].mxu0  ;;  %v677_v53 = vmin.f32 %v2204_v49, %v2207_v51 }
 0x140   : > { %v2212_v54 = vsub.f32 %v2135_v6, %v568_v52  ;;  %v570_v55 = vpop.f32.mrb[19].mxu0 }
 0x141   : > { %v2215_v56 = vsub.f32 %v2137_v7, %v570_v55  ;;  %678 = vmin.xlane.f32.xlu0 %v677_v53 }
 0x143   : > { %v574_v57 = vpop.f32.mrb[20].mxu0  ;;  %v680_v58 = vmin.f32 %v2212_v54, %v2215_v56 }
 0x144   : > { %v2220_v59 = vsub.f32 %v2135_v6, %v574_v57  ;;  %v576_v60 = vpop.f32.mrb[21].mxu0 }
 0x145   : > { %v2223_v61 = vsub.f32 %v2137_v7, %v576_v60  ;;  %681 = vmin.xlane.f32.xlu1 %v680_v58 }
 0x147   : > { %v580_v62 = vpop.f32.mrb[22].mxu0  ;;  %v683_v63 = vmin.f32 %v2220_v59, %v2223_v61 }
 0x148   : > { %v2228_v0 = vsub.f32 %v2135_v6, %v580_v62  ;;  %v582_v2 = vpop.f32.mrb[23].mxu0 }
 0x149   : > { %v2231_v3 = vsub.f32 %v2137_v7, %v582_v2  ;;  %684 = vmin.xlane.f32.xlu0 %v683_v63 }
 0x14b   : > { %v586_v4 = vpop.f32.mrb[24].mxu0  ;;  %v686_v5 = vmin.f32 %v2228_v0, %v2231_v3 }
 0x14c   : > { %v2236_v8 = vsub.f32 %v2135_v6, %v586_v4  ;;  %v588_v10 = vpop.f32.mrb[25].mxu0 }
 0x14d   : > { %v2239_v12 = vsub.f32 %v2137_v7, %v588_v10  ;;  %687 = vmin.xlane.f32.xlu1 %v686_v5 }
 0x14f   : > { %v592_v13 = vpop.f32.mrb[26].mxu0  ;;  %v689_v15 = vmin.f32 %v2236_v8, %v2239_v12 }
 0x150   : > { %v2244_v17 = vsub.f32 %v2135_v6, %v592_v13  ;;  %v594_v18 = vpop.f32.mrb[27].mxu0 }
 0x151   : > { %v2247_v20 = vsub.f32 %v2137_v7, %v594_v18  ;;  %690 = vmin.xlane.f32.xlu0 %v689_v15 }
 0x153   : > { %v598_v22 = vpop.f32.mrb[28].mxu0  ;;  %v692_v23 = vmin.f32 %v2244_v17, %v2247_v20 }
 0x154   : > { %v2252_v25 = vsub.f32 %v2135_v6, %v598_v22  ;;  %v600_v27 = vpop.f32.mrb[29].mxu0 }
 0x155   : > { %v2255_v28 = vsub.f32 %v2137_v7, %v600_v27  ;;  %693 = vmin.xlane.f32.xlu1 %v692_v23 }
 0x157   : > { %v604_v30 = vpop.f32.mrb[30].mxu0  ;;  %v695_v32 = vmin.f32 %v2252_v25, %v2255_v28 }
 0x158   : > { %v2260_v33 = vsub.f32 %v2135_v6, %v604_v30  ;;  %v606_v35 = vpop.f32.mrb[31].mxu0 }
 0x159   : > { %v2263_v37 = vsub.f32 %v2137_v7, %v606_v35  ;;  %696 = vmin.xlane.f32.xlu0 %v695_v32 }
 0x15b   : > { %v698_v38 = vmin.f32 %v2260_v33, %v2263_v37 }
 0x15d   : > { %699 = vmin.xlane.f32.xlu1 %v698_v38 }
 0x1ae   : > { %v655_v43 = vpop.xlane.xlu0 %654 }
 0x1af   : > { %vm704_vm2 = vcmp.eq.f32.partialorder %v2140_v9, %v655_v43  ;;  %vm705_vm3 = vcmp.eq.f32.partialorder %v2143_v11, %v655_v43 }
 0x1b0   : > { %v736_v6 = vsel %vm704_vm2, %v2268_v40, 256  ;;  %v737_v7 = vsel %vm705_vm3, %v2271_v42, 256 }
 0x1b1   : > { %vm768_vm4 = vcmp.lt.s32.totalorder %v736_v6, %v737_v7 }
 0x1b2   : > { %v658_v45 = vpop.xlane.xlu0 %657  ;;  %v2277_v47 = vsel %vm768_vm4, %v736_v6, %v737_v7 }
 0x1b3   : > { %vm706_vm5 = vcmp.eq.f32.partialorder %v2148_v14, %v658_v45  ;;  %vm707_vm6 = vcmp.eq.f32.partialorder %v2151_v16, %v658_v45  ;;  %v771_v1 = vshra.s32 %v2277_v47, 16 }
 0x1b4   : > { %v738_v48 = vsel %vm706_vm5, %v2268_v40, 256  ;;  %v739_v9 = vsel %vm707_vm6, %v2271_v42, 256 }
 0x1b5   : > { %vm784_vm7 = vcmp.lt.s32.totalorder %v738_v48, %v739_v9  ;;  %v2284_v11 = vcvt.s32.f32 %v771_v1 }
 0x1b6   : > { %v661_v50 = vpop.xlane.xlu1 %660  ;;  %v2286_v52 = vsel %vm784_vm7, %v738_v48, %v739_v9 }
 0x1b7   : > { %vm708_vm8 = vcmp.eq.f32.partialorder %v2156_v19, %v661_v50  ;;  %vm709_vm9 = vcmp.eq.f32.partialorder %v2159_v21, %v661_v50  ;;  %774 = vmin.xlane.f32.xlu0 %v2284_v11  ;;  %v787_v14 = vshra.s32 %v2286_v52, 16 }
 0x1b8   : > { %v740_v16 = vsel %vm708_vm8, %v2268_v40, 256  ;;  %v741_v53 = vsel %vm709_vm9, %v2271_v42, 256 }
 0x1b9   : > { %vm800_vm10 = vcmp.lt.s32.totalorder %v740_v16, %v741_v53  ;;  %v2294_v55 = vcvt.s32.f32 %v787_v14 }
 0x1ba   : > { %v664_v57 = vpop.xlane.xlu1 %663  ;;  %v2296_v58 = vsel %vm800_vm10, %v740_v16, %v741_v53 }
 0x1bb   : > { %vm710_vm11 = vcmp.eq.f32.partialorder %v2164_v24, %v664_v57  ;;  %vm711_vm12 = vcmp.eq.f32.partialorder %v2167_v26, %v664_v57  ;;  %790 = vmin.xlane.f32.xlu1 %v2294_v55  ;;  %v803_v19 = vshra.s32 %v2296_v58, 16 }
 0x1bc   : > { %v742_v21 = vsel %vm710_vm11, %v2268_v40, 256  ;;  %v743_v60 = vsel %vm711_vm12, %v2271_v42, 256 }
 0x1bd   : > { %vm816_vm13 = vcmp.lt.s32.totalorder %v742_v21, %v743_v60  ;;  %v2304_v62 = vcvt.s32.f32 %v803_v19 }
 0x1be   : > { %v667_v63 = vpop.xlane.xlu0 %666  ;;  %v2306_v2 = vsel %vm816_vm13, %v742_v21, %v743_v60 }
 0x1bf   : > { %vm712_vm14 = vcmp.eq.f32.partialorder %v2172_v29, %v667_v63  ;;  %vm713_vm15 = vcmp.eq.f32.partialorder %v2175_v31, %v667_v63  ;;  %806 = vmin.xlane.f32.xlu0 %v2304_v62  ;;  %v819_v24 = vshra.s32 %v2306_v2, 16 }
 0x1c0   : > { %v744_v26 = vsel %vm712_vm14, %v2268_v40, 256  ;;  %v745_v4 = vsel %vm713_vm15, %v2271_v42, 256 }
 0x1c1   : > { %vm832_vm1 = vcmp.lt.s32.totalorder %v744_v26, %v745_v4  ;;  %v2314_v5 = vcvt.s32.f32 %v819_v24 }
 0x1c2   : > { %v670_v10 = vpop.xlane.xlu1 %669  ;;  %v2316_v13 = vsel %vm832_vm1, %v744_v26, %v745_v4 }
 0x1c3   : > { %vm714_vm2 = vcmp.eq.f32.partialorder %v2180_v34, %v670_v10  ;;  %vm715_vm3 = vcmp.eq.f32.partialorder %v2183_v36, %v670_v10  ;;  %822 = vmin.xlane.f32.xlu1 %v2314_v5  ;;  %v835_v29 = vshra.s32 %v2316_v13, 16 }
 0x1c4   : > { %v746_v31 = vsel %vm714_vm2, %v2268_v40, 256  ;;  %v747_v15 = vsel %vm715_vm3, %v2271_v42, 256 }
 0x1c5   : > { %vm848_vm4 = vcmp.lt.s32.totalorder %v746_v31, %v747_v15  ;;  %v2324_v18 = vcvt.s32.f32 %v835_v29 }
 0x1c6   : > { %v673_v22 = vpop.xlane.xlu0 %672  ;;  %v2326_v23 = vsel %vm848_vm4, %v746_v31, %v747_v15 }
 0x1c7   : > { %vm716_vm5 = vcmp.eq.f32.partialorder %v2188_v39, %v673_v22  ;;  %vm717_vm6 = vcmp.eq.f32.partialorder %v2191_v41, %v673_v22  ;;  %838 = vmin.xlane.f32.xlu0 %v2324_v18  ;;  %v851_v34 = vshra.s32 %v2326_v23, 16 }
 0x1c8   : > { %v748_v36 = vsel %vm716_vm5, %v2268_v40, 256  ;;  %v749_v27 = vsel %vm717_vm6, %v2271_v42, 256 }
 0x1c9   : > { %vm864_vm7 = vcmp.lt.s32.totalorder %v748_v36, %v749_v27  ;;  %v2334_v30 = vcvt.s32.f32 %v851_v34 }
 0x1ca   : > { %v676_v32 = vpop.xlane.xlu1 %675  ;;  %v2336_v35 = vsel %vm864_vm7, %v748_v36, %v749_v27 }
 0x1cb   : > { %vm718_vm8 = vcmp.eq.f32.partialorder %v2196_v44, %v676_v32  ;;  %vm719_vm9 = vcmp.eq.f32.partialorder %v2199_v46, %v676_v32  ;;  %854 = vmin.xlane.f32.xlu1 %v2334_v30  ;;  %v867_v39 = vshra.s32 %v2336_v35, 16 }
 0x1cc   : > { %v750_v41 = vsel %vm718_vm8, %v2268_v40, 256  ;;  %v751_v38 = vsel %vm719_vm9, %v2271_v42, 256 }
 0x1cd   : > { %vm880_vm10 = vcmp.lt.s32.totalorder %v750_v41, %v751_v38  ;;  %v2344_v43 = vcvt.s32.f32 %v867_v39 }
 0x1ce   : > { %v679_v6 = vpop.xlane.xlu0 %678  ;;  %v2346_v7 = vsel %vm880_vm10, %v750_v41, %v751_v38 }
 0x1cf   : > { %vm720_vm11 = vcmp.eq.f32.partialorder %v2204_v49, %v679_v6  ;;  %vm721_vm12 = vcmp.eq.f32.partialorder %v2207_v51, %v679_v6  ;;  %870 = vmin.xlane.f32.xlu0 %v2344_v43  ;;  %v883_v44 = vshra.s32 %v2346_v7, 16 }
 0x1d0   : > { %v752_v46 = vsel %vm720_vm11, %v2268_v40, 256  ;;  %v753_v45 = vsel %vm721_vm12, %v2271_v42, 256 }
 0x1d1   : > { %vm896_vm13 = vcmp.lt.s32.totalorder %v752_v46, %v753_v45  ;;  %v2354_v1 = vcvt.s32.f32 %v883_v44 }
 0x1d2   : > { %v682_v48 = vpop.xlane.xlu1 %681  ;;  %v2356_v9 = vsel %vm896_vm13, %v752_v46, %v753_v45 }
 0x1d3   : > { %vm722_vm14 = vcmp.eq.f32.partialorder %v2212_v54, %v682_v48  ;;  %vm723_vm15 = vcmp.eq.f32.partialorder %v2215_v56, %v682_v48  ;;  %886 = vmin.xlane.f32.xlu1 %v2354_v1  ;;  %v899_v49 = vshra.s32 %v2356_v9, 16 }
 0x1d4   : > { %v754_v51 = vsel %vm722_vm14, %v2268_v40, 256  ;;  %v755_v50 = vsel %vm723_vm15, %v2271_v42, 256 }
 0x1d5   : > { %vm912_vm1 = vcmp.lt.s32.totalorder %v754_v51, %v755_v50  ;;  %v2364_v14 = vcvt.s32.f32 %v899_v49 }
 0x1d6   : > { %v685_v16 = vpop.xlane.xlu0 %684  ;;  %v2366_v53 = vsel %vm912_vm1, %v754_v51, %v755_v50  ;;  %v786_v51 = vand.u32 65535, %v2286_v52  ;;  %v818_v52 = vand.u32 65535, %v2306_v2  ;;  %v850_v2 = vand.u32 65535, %v2326_v23 }
 0x1d7   : > { %vm724_vm2 = vcmp.eq.f32.partialorder %v2220_v59, %v685_v16  ;;  %vm725_vm3 = vcmp.eq.f32.partialorder %v2223_v61, %v685_v16  ;;  %902 = vmin.xlane.f32.xlu0 %v2364_v14  ;;  %v915_v54 = vshra.s32 %v2366_v53, 16  ;;  %v882_v23 = vand.u32 65535, %v2346_v7 }
 0x1d8   : > { %v756_v56 = vsel %vm724_vm2, %v2268_v40, 256  ;;  %v757_v57 = vsel %vm725_vm3, %v2271_v42, 256  ;;  %v914_v7 = vand.u32 65535, %v2366_v53 }
 0x1d9   : > { %vm928_vm4 = vcmp.lt.s32.totalorder %v756_v56, %v757_v57  ;;  %v2374_v19 = vcvt.s32.f32 %v915_v54  ;;  %v788_v54 = vcvt.s32.f32 %v786_v51 }
 0x1da   : > { %v688_v21 = vpop.xlane.xlu1 %687  ;;  %v2376_v60 = vsel %vm928_vm4, %v756_v56, %v757_v57  ;;  %v802_v56 = vand.u32 65535, %v2296_v58  ;;  %v834_v58 = vand.u32 65535, %v2316_v13  ;;  %v866_v13 = vand.u32 65535, %v2336_v35 }
 0x1db   : > { %vm726_vm5 = vcmp.eq.f32.partialorder %v2228_v0, %v688_v21  ;;  %vm727_vm6 = vcmp.eq.f32.partialorder %v2231_v3, %v688_v21  ;;  %918 = vmin.xlane.f32.xlu1 %v2374_v19  ;;  %v931_v59 = vshra.s32 %v2376_v60, 16  ;;  %v898_v35 = vand.u32 65535, %v2356_v9 }
 0x1dc   : > { %v758_v61 = vsel %vm726_vm5, %v2268_v40, 256  ;;  %v759_v63 = vsel %vm727_vm6, %v2271_v42, 256  ;;  %v804_v21 = vcvt.s32.f32 %v802_v56  ;;  %v930_v9 = vand.u32 65535, %v2376_v60 }
 0x1dd   : > { %vm944_vm7 = vcmp.lt.s32.totalorder %v758_v61, %v759_v63  ;;  %v2384_v24 = vcvt.s32.f32 %v931_v59 }
 0x1de   : > { %v691_v26 = vpop.xlane.xlu0 %690  ;;  %v2386_v4 = vsel %vm944_vm7, %v758_v61, %v759_v63  ;;  %v820_v61 = vcvt.s32.f32 %v818_v52 }
 0x1df   : > { %vm728_vm8 = vcmp.eq.f32.partialorder %v2236_v8, %v691_v26  ;;  %vm729_vm9 = vcmp.eq.f32.partialorder %v2239_v12, %v691_v26  ;;  %934 = vmin.xlane.f32.xlu0 %v2384_v24  ;;  %v947_v0 = vshra.s32 %v2386_v4, 16  ;;  %v836_v26 = vcvt.s32.f32 %v834_v58 }
 0x1e0   : > { %v760_v3 = vsel %vm728_vm8, %v2268_v40, 256  ;;  %v761_v10 = vsel %vm729_vm9, %v2271_v42, 256  ;;  %v946_v53 = vand.u32 65535, %v2386_v4 }
 0x1e1   : > { %vm960_vm10 = vcmp.lt.s32.totalorder %v760_v3, %v761_v10  ;;  %v2394_v29 = vcvt.s32.f32 %v947_v0 }
 0x1e2   : > { %v694_v31 = vpop.xlane.xlu1 %693  ;;  %v2396_v15 = vsel %vm960_vm10, %v760_v3, %v761_v10  ;;  %v852_v3 = vcvt.s32.f32 %v850_v2 }
 0x1e3   : > { %vm730_vm11 = vcmp.eq.f32.partialorder %v2244_v17, %v694_v31  ;;  %vm731_vm12 = vcmp.eq.f32.partialorder %v2247_v20, %v694_v31  ;;  %950 = vmin.xlane.f32.xlu1 %v2394_v29  ;;  %v963_v8 = vshra.s32 %v2396_v15, 16  ;;  %v868_v31 = vcvt.s32.f32 %v866_v13 }
 0x1e4   : > { %v762_v12 = vsel %vm730_vm11, %v2268_v40, 256  ;;  %v763_v22 = vsel %vm731_vm12, %v2271_v42, 256  ;;  %v962_v60 = vand.u32 65535, %v2396_v15 }
 0x1e5   : > { %vm976_vm13 = vcmp.lt.s32.totalorder %v762_v12, %v763_v22  ;;  %v2404_v34 = vcvt.s32.f32 %v963_v8 }
 0x1e6   : > { %v697_v36 = vpop.xlane.xlu0 %696  ;;  %v2406_v27 = vsel %vm976_vm13, %v762_v12, %v763_v22  ;;  %v884_v12 = vcvt.s32.f32 %v882_v23 }
 0x1e7   : > { %vm732_vm14 = vcmp.eq.f32.partialorder %v2252_v25, %v697_v36  ;;  %vm733_vm15 = vcmp.eq.f32.partialorder %v2255_v28, %v697_v36  ;;  %966 = vmin.xlane.f32.xlu0 %v2404_v34  ;;  %v979_v17 = vshra.s32 %v2406_v27, 16  ;;  %v900_v36 = vcvt.s32.f32 %v898_v35 }
 0x1e8   : > { %v764_v20 = vsel %vm732_vm14, %v2268_v40, 256  ;;  %v765_v32 = vsel %vm733_vm15, %v2271_v42, 256  ;;  %v978_v4 = vand.u32 65535, %v2406_v27 }
 0x1e9   : > { %vm992_vm1 = vcmp.lt.s32.totalorder %v764_v20, %v765_v32  ;;  %v2414_v39 = vcvt.s32.f32 %v979_v17 }
 0x1ea   : > { %v700_v41 = vpop.xlane.xlu1 %699  ;;  %v2416_v38 = vsel %vm992_vm1, %v764_v20, %v765_v32  ;;  %v916_v20 = vcvt.s32.f32 %v914_v7 }
 0x1eb   : > { %vm734_vm2 = vcmp.eq.f32.partialorder %v2260_v33, %v700_v41  ;;  %vm735_vm3 = vcmp.eq.f32.partialorder %v2263_v37, %v700_v41  ;;  %982 = vmin.xlane.f32.xlu1 %v2414_v39  ;;  %v995_v25 = vshra.s32 %v2416_v38, 16  ;;  %v770_v37 = vand.u32 65535, %v2277_v47 }
 0x1ec   : > { %v766_v28 = vsel %vm734_vm2, %v2268_v40, 256  ;;  %v767_v6 = vsel %vm735_vm3, %v2271_v42, 256  ;;  %v932_v41 = vcvt.s32.f32 %v930_v9  ;;  %v994_v15 = vand.u32 65535, %v2416_v38 }
 0x1ed   : > { %vm1008_vm4 = vcmp.lt.s32.totalorder %v766_v28, %v767_v6  ;;  %v2424_v44 = vcvt.s32.f32 %v995_v25  ;;  %v772_v49 = vcvt.s32.f32 %v770_v37 }
 0x1ee   : > { %v2426_v46 = vsel %vm1008_vm4, %v766_v28, %v767_v6  ;;  %v948_v28 = vcvt.s32.f32 %v946_v53 }
 0x1ef   : > { %998 = vmin.xlane.f32.xlu0 %v2424_v44  ;;  %v1011_v45 = vshra.s32 %v2426_v46, 16  ;;  %v1010_v27 = vand.u32 65535, %v2426_v46 }
 0x1f1   : > { %v2430_v33 = vcvt.s32.f32 %v1011_v45  ;;  %v964_v45 = vcvt.s32.f32 %v962_v60  ;;  %v1012_v56 = vcvt.s32.f32 %v1010_v27 }
 0x1f3   : > { %1014 = vmin.xlane.f32.xlu1 %v2430_v33 }
 0x244   : > { %v2434_v48 = vpop.xlane.xlu0 %774 }
 0x245   : > { %vm776_vm5 = vcmp.eq.f32.partialorder %v2284_v11, %v2434_v48  ;;  %v781_v38 = vcvt.f32.s32 %v2434_v48 }
 0x246   : > { %v777_v50 = vsel %vm776_vm5, %v772_v49, inf  ;;  %v980_v49 = vcvt.s32.f32 %v978_v4 }
 0x247   : > { %778 = vmin.xlane.f32.xlu0 %v777_v50  ;;  %v996_v50 = vcvt.s32.f32 %v994_v15 }
 0x248   : > { %v2439_v16 = vpop.xlane.xlu1 %790 }
 0x249   : > { %vm792_vm6 = vcmp.eq.f32.partialorder %v2294_v55, %v2439_v16  ;;  %v797_v52 = vcvt.f32.s32 %v2439_v16  ;;  %v1902_v16 = vmov 1.0  }
 0x24a   : > { %v793_v57 = vsel %vm792_vm6, %v788_v54, inf  ;;  %vm1281_vm6 = vcmask 7168  }
 0x24b   : > { %794 = vmin.xlane.f32.xlu1 %v793_v57 }
 0x24c   : > { %v2444_v47 = vpop.xlane.xlu0 %806 }
 0x24d   : > { %vm808_vm7 = vcmp.eq.f32.partialorder %v2304_v62, %v2444_v47 }
 0x24e   : > { %v809_v11 = vsel %vm808_vm7, %v804_v21, inf  ;;  %v782_v21 = vshll.u32 %v781_v38, 16 }
 0x24f   : > { %810 = vmin.xlane.f32.xlu0 %v809_v11 }
 0x250   : > { %v2449_v59 = vpop.xlane.xlu1 %822 }
 0x251   : > { %vm824_vm8 = vcmp.eq.f32.partialorder %v2314_v5, %v2449_v59 }
 0x252   : > { %v825_v55 = vsel %vm824_vm8, %v820_v61, inf  ;;  %v798_v61 = vshll.u32 %v797_v52, 16 }
 0x253   : > { %826 = vmin.xlane.f32.xlu1 %v825_v55 }
 0x254   : > { %v2454_v63 = vpop.xlane.xlu0 %838 }
 0x255   : > { %vm840_vm9 = vcmp.eq.f32.partialorder %v2324_v18, %v2454_v63 }
 0x256   : > { %v841_v62 = vsel %vm840_vm9, %v836_v26, inf }
 0x257   : > { %842 = vmin.xlane.f32.xlu0 %v841_v62 }
 0x258   : > { %v2459_v0 = vpop.xlane.xlu1 %854 }
 0x259   : > { %vm856_vm10 = vcmp.eq.f32.partialorder %v2334_v30, %v2459_v0 }
 0x25a   : > { %v857_v5 = vsel %vm856_vm10, %v852_v3, inf  ;;  %v845_v3 = vcvt.f32.s32 %v2454_v63 }
 0x25b   : > { %858 = vmin.xlane.f32.xlu1 %v857_v5 }
 0x25c   : > { %v2464_v10 = vpop.xlane.xlu0 %870  ;;  %v846_v23 = vshll.u32 %v845_v3, 16 }
 0x25d   : > { %vm872_vm11 = vcmp.eq.f32.partialorder %v2344_v43, %v2464_v10 }
 0x25e   : > { %v873_v18 = vsel %vm872_vm11, %v868_v31, inf }
 0x25f   : > { %874 = vmin.xlane.f32.xlu0 %v873_v18 }
 0x260   : > { %v2469_v8 = vpop.xlane.xlu1 %886 }
 0x261   : > { %vm888_vm12 = vcmp.eq.f32.partialorder %v2354_v1, %v2469_v8 }
 0x262   : > { %v889_v30 = vsel %vm888_vm12, %v884_v12, inf  ;;  %v861_v12 = vcvt.f32.s32 %v2459_v0 }
 0x263   : > { %890 = vmin.xlane.f32.xlu1 %v889_v30  ;;  %v877_v30 = vcvt.f32.s32 %v2464_v10 }
 0x264   : > { %v2474_v22 = vpop.xlane.xlu0 %902  ;;  %v862_v7 = vshll.u32 %v861_v12, 16 }
 0x265   : > { %vm904_vm13 = vcmp.eq.f32.partialorder %v2364_v14, %v2474_v22  ;;  %v909_v53 = vcvt.f32.s32 %v2474_v22 }
 0x266   : > { %v905_v43 = vsel %vm904_vm13, %v900_v36, inf }
 0x267   : > { %906 = vmin.xlane.f32.xlu0 %v905_v43 }
 0x268   : > { %v2479_v17 = vpop.xlane.xlu1 %918 }
 0x269   : > { %vm920_vm14 = vcmp.eq.f32.partialorder %v2374_v19, %v2479_v17  ;;  %v925_v4 = vcvt.f32.s32 %v2479_v17 }
 0x26a   : > { %v921_v1 = vsel %vm920_vm14, %v916_v20, inf  ;;  %v878_v20 = vshll.u32 %v877_v30, 16 }
 0x26b   : > { %922 = vmin.xlane.f32.xlu1 %v921_v1  ;;  %v893_v1 = vcvt.f32.s32 %v2469_v8 }
 0x26c   : > { %v2484_v32 = vpop.xlane.xlu0 %934 }
 0x26d   : > { %vm936_vm15 = vcmp.eq.f32.partialorder %v2384_v24, %v2484_v32 }
 0x26e   : > { %v937_v14 = vsel %vm936_vm15, %v932_v41, inf }
 0x26f   : > { %938 = vmin.xlane.f32.xlu0 %v937_v14 }
 0x270   : > { %v2489_v25 = vpop.xlane.xlu1 %950 }
 0x271   : > { %vm952_vm1 = vcmp.eq.f32.partialorder %v2394_v29, %v2489_v25 }
 0x272   : > { %v953_v19 = vsel %vm952_vm1, %v948_v28, inf  ;;  %v894_v28 = vshll.u32 %v893_v1, 16 }
 0x273   : > { %954 = vmin.xlane.f32.xlu1 %v953_v19  ;;  %v910_v19 = vshll.u32 %v909_v53, 16 }
 0x274   : > { %v2494_v6 = vpop.xlane.xlu0 %966 }
 0x275   : > { %vm968_vm2 = vcmp.eq.f32.partialorder %v2404_v34, %v2494_v6  ;;  %v973_v38 = vcvt.f32.s32 %v2494_v6 }
 0x276   : > { %v969_v24 = vsel %vm968_vm2, %v964_v45, inf }
 0x277   : > { %970 = vmin.xlane.f32.xlu0 %v969_v24 }
 0x278   : > { %v2499_v37 = vpop.xlane.xlu1 %982 }
 0x279   : > { %vm984_vm3 = vcmp.eq.f32.partialorder %v2414_v39, %v2499_v37 }
 0x27a   : > { %v985_v29 = vsel %vm984_vm3, %v980_v49, inf  ;;  %v941_v49 = vcvt.f32.s32 %v2484_v32 }
 0x27b   : > { %986 = vmin.xlane.f32.xlu1 %v985_v29  ;;  %v926_v29 = vshll.u32 %v925_v4, 16 }
 0x27c   : > { %v2504_v51 = vpop.xlane.xlu0 %998  ;;  %v942_v27 = vshll.u32 %v941_v49, 16  ;;  %v1882_v49 = vld [vmem:[%s1995_s24 + $0x20] sm:$0xff] }
 0x27d   : > { %vm1000_vm4 = vcmp.eq.f32.partialorder %v2424_v44, %v2504_v51 }
 0x27e   : > { %v1001_v34 = vsel %vm1000_vm4, %v996_v50, inf }
 0x27f   : > { %1002 = vmin.xlane.f32.xlu0 %v1001_v34 }
 0x280   : > { %v2509_v54 = vpop.xlane.xlu1 %1014 }
 0x281   : > { %vm1016_vm5 = vcmp.eq.f32.partialorder %v2430_v33, %v2509_v54  ;;  %v813_v33 = vcvt.f32.s32 %v2444_v47  ;;  %v829_v47 = vcvt.f32.s32 %v2449_v59 }
 0x282   : > { %v1017_v39 = vsel %vm1016_vm5, %v1012_v56, inf  ;;  %v957_v56 = vcvt.f32.s32 %v2489_v25 }
 0x283   : > { %1018 = vmin.xlane.f32.xlu1 %v1017_v39  ;;  %v814_v55 = vshll.u32 %v813_v33, 16  ;;  %v830_v5 = vshll.u32 %v829_v47, 16  ;;  %v989_v33 = vcvt.f32.s32 %v2499_v37 }
 0x2d4   : > { %v779_v57 = vpop.xlane.xlu0 %778 }
 0x2d5   : > { %v780_v46 = vcvt.f32.s32 %v779_v57 }
 0x2d7   : > { %v783_v44 = vadd.s32 %v782_v21, %v780_v46  ;;  %v958_v21 = vshll.u32 %v957_v56, 16  ;;  %v974_v46 = vshll.u32 %v973_v38, 16  ;;  %v1883_v56 = vld [vmem:[%s1995_s24 + $0x28] sm:$0xff] }
 0x2d8   : > { %v795_v11 = vpop.xlane.xlu1 %794 }
 0x2d9   : > { %1282 = vst.msk [vmem:[%s2519_s25] sm:$0xff] %vm1281_vm6, %v783_v44  ;;  %v796_v48 = vcvt.f32.s32 %v795_v11  ;;  %vm1025_vm7 = vcmp.eq.s32.totalorder %v2271_v42, %v783_v44  ;;  %vm1024_vm8 = vcmp.eq.s32.totalorder %v2268_v40, %v783_v44 }
 0x2da   : > { %1611 = vmatprep.mubr.msk.f32.mxu1 %vm1025_vm7, %v1902_v16 }
 0x2db   : > { %v799_v58 = vadd.s32 %v798_v61, %v796_v48  ;;  %1612 = vmatmul.mubr.msk.f32.vlgmr.msra.gmra.mrb[0].mxu1 %vm1024_vm8, %v1902_v16  ;;  %v1005_v61 = vcvt.f32.s32 %v2504_v51 }
 0x2dc   : > { %v811_v26 = vpop.xlane.xlu0 %810 }
 0x2dd   : > { %1283 = vst.msk [vmem:[%s2519_s25 + $0x8] sm:$0xff] %vm1281_vm6, %v799_v58  ;;  %v812_v2 = vcvt.f32.s32 %v811_v26  ;;  %vm1027_vm9 = vcmp.eq.s32.totalorder %v2271_v42, %v799_v58  ;;  %vm1026_vm10 = vcmp.eq.s32.totalorder %v2268_v40, %v799_v58  ;;  %v990_v58 = vshll.u32 %v989_v33, 16 }
 0x2de   : > { %1613 = vmatprep.mubr.msk.f32.mxu1 %vm1027_vm9, %v1902_v16  ;;  %v1006_v26 = vshll.u32 %v1005_v61, 16 }
 0x2df   : > { %v815_v62 = vadd.s32 %v814_v55, %v812_v2  ;;  %1614 = vmatmul.mubr.msk.f32.gmra.mrb[2].mxu1 %vm1026_vm10, %v1902_v16  ;;  %v1021_v2 = vcvt.f32.s32 %v2509_v54 }
 0x2e0   : > { %v827_v13 = vpop.xlane.xlu1 %826 }
 0x2e1   : > { %1284 = vst.msk [vmem:[%s2519_s25 + $0x10] sm:$0xff] %vm1281_vm6, %v815_v62  ;;  %v828_v59 = vcvt.f32.s32 %v827_v13  ;;  %vm1029_vm11 = vcmp.eq.s32.totalorder %v2271_v42, %v815_v62  ;;  %vm1028_vm12 = vcmp.eq.s32.totalorder %v2268_v40, %v815_v62  ;;  %v1022_v13 = vshll.u32 %v1021_v2, 16 }
 0x2e2   : > { %1615 = vmatprep.mubr.msk.f32.mxu1 %vm1029_vm11, %v1902_v16 }
 0x2e3   : > { %v831_v31 = vadd.s32 %v830_v5, %v828_v59  ;;  %1616 = vmatmul.mubr.msk.f32.gmra.mrb[4].mxu1 %vm1028_vm12, %v1902_v16 }
 0x2e4   : > { %v843_v18 = vpop.xlane.xlu0 %842 }
 0x2e5   : > { %1285 = vst.msk [vmem:[%s2519_s25 + $0x18] sm:$0xff] %vm1281_vm6, %v831_v31  ;;  %v844_v63 = vcvt.f32.s32 %v843_v18  ;;  %vm1031_vm13 = vcmp.eq.s32.totalorder %v2271_v42, %v831_v31  ;;  %vm1030_vm14 = vcmp.eq.s32.totalorder %v2268_v40, %v831_v31 }
 0x2e6   : > { %1617 = vmatprep.mubr.msk.f32.mxu1 %vm1031_vm13, %v1902_v16 }
 0x2e7   : > { %v847_v35 = vadd.s32 %v846_v23, %v844_v63  ;;  %1618 = vmatmul.mubr.msk.f32.gmra.mrb[6].mxu1 %vm1030_vm14, %v1902_v16 }
 0x2e8   : > { %v859_v36 = vpop.xlane.xlu1 %858 }
 0x2e9   : > { %1286 = vst.msk [vmem:[%s2519_s25 + $0x20] sm:$0xff] %vm1281_vm6, %v847_v35  ;;  %v860_v0 = vcvt.f32.s32 %v859_v36  ;;  %vm1033_vm15 = vcmp.eq.s32.totalorder %v2271_v42, %v847_v35  ;;  %vm1032_vm1 = vcmp.eq.s32.totalorder %v2268_v40, %v847_v35  ;;  %v1879_v35 = vld [vmem:[%s1995_s24 + $0x8] sm:$0xff] }
 0x2ea   : > { %1619 = vmatprep.mubr.msk.f32.mxu1 %vm1033_vm15, %v1902_v16 }
 0x2eb   : > { %v863_v43 = vadd.s32 %v862_v7, %v860_v0  ;;  %1620 = vmatmul.mubr.msk.f32.gmra.mrb[8].mxu1 %vm1032_vm1, %v1902_v16 }
 0x2ec   : > { %v875_v9 = vpop.xlane.xlu0 %874 }
 0x2ed   : > { %1287 = vst.msk [vmem:[%s2519_s25 + $0x28] sm:$0xff] %vm1281_vm6, %v863_v43  ;;  %v876_v10 = vcvt.f32.s32 %v875_v9  ;;  %vm1035_vm2 = vcmp.eq.s32.totalorder %v2271_v42, %v863_v43  ;;  %vm1034_vm3 = vcmp.eq.s32.totalorder %v2268_v40, %v863_v43  ;;  %v1880_v9 = vld [vmem:[%s1995_s24 + $0x10] sm:$0xff] }
 0x2ee   : > { %1621 = vmatprep.mubr.msk.f32.mxu1 %vm1035_vm2, %v1902_v16 }
 0x2ef   : > { %v879_v41 = vadd.s32 %v878_v20, %v876_v10  ;;  %1622 = vmatmul.mubr.msk.f32.gmra.mrb[10].mxu1 %vm1034_vm3, %v1902_v16 }
 0x2f0   : > { %v891_v14 = vpop.xlane.xlu1 %890 }
 0x2f1   : > { %1288 = vst.msk [vmem:[%s2519_s25 + $0x30] sm:$0xff] %vm1281_vm6, %v879_v41  ;;  %v892_v8 = vcvt.f32.s32 %v891_v14  ;;  %vm1037_vm4 = vcmp.eq.s32.totalorder %v2271_v42, %v879_v41  ;;  %vm1036_vm5 = vcmp.eq.s32.totalorder %v2268_v40, %v879_v41 }
 0x2f2   : > { %1623 = vmatprep.mubr.msk.f32.mxu1 %vm1037_vm4, %v1902_v16 }
 0x2f3   : > { %v895_v60 = vadd.s32 %v894_v28, %v892_v8  ;;  %1624 = vmatmul.mubr.msk.f32.gmra.mrb[12].mxu1 %vm1036_vm5, %v1902_v16  ;;  %v1881_v8 = vld [vmem:[%s1995_s24 + $0x18] sm:$0xff] }
 0x2f4   : > { %v907_v45 = vpop.xlane.xlu0 %906 }
 0x2f5   : > { %1289 = vst.msk [vmem:[%s2519_s25 + $0x38] sm:$0xff] %vm1281_vm6, %v895_v60  ;;  %v908_v22 = vcvt.f32.s32 %v907_v45  ;;  %vm1039_vm7 = vcmp.eq.s32.totalorder %v2271_v42, %v895_v60  ;;  %vm1038_vm8 = vcmp.eq.s32.totalorder %v2268_v40, %v895_v60 }
 0x2f6   : > { %1625 = vmatprep.mubr.msk.f32.mxu1 %vm1039_vm7, %v1902_v16 }
 0x2f7   : > { %v911_v24 = vadd.s32 %v910_v19, %v908_v22  ;;  %1626 = vmatmul.mubr.msk.f32.gmra.mrb[14].mxu1 %vm1038_vm8, %v1902_v16 }
 0x2f8   : > { %v923_v15 = vpop.xlane.xlu1 %922 }
 0x2f9   : > { %1290 = vst.msk [vmem:[%s2519_s25 + $0x40] sm:$0xff] %vm1281_vm6, %v911_v24  ;;  %v924_v17 = vcvt.f32.s32 %v923_v15  ;;  %vm1041_vm9 = vcmp.eq.s32.totalorder %v2271_v42, %v911_v24  ;;  %vm1040_vm10 = vcmp.eq.s32.totalorder %v2268_v40, %v911_v24 }
 0x2fa   : > { %1627 = vmatprep.mubr.msk.f32.mxu1 %vm1041_vm9, %v1902_v16 }
 0x2fb   : > { %v927_v50 = vadd.s32 %v926_v29, %v924_v17  ;;  %1628 = vmatmul.mubr.msk.f32.gmra.mrb[16].mxu1 %vm1040_vm10, %v1902_v16 }
 0x2fc   : > { %v939_v34 = vpop.xlane.xlu0 %938 }
 0x2fd   : > { %1291 = vst.msk [vmem:[%s2519_s25 + $0x48] sm:$0xff] %vm1281_vm6, %v927_v50  ;;  %v940_v32 = vcvt.f32.s32 %v939_v34  ;;  %vm1043_vm11 = vcmp.eq.s32.totalorder %v2271_v42, %v927_v50  ;;  %vm1042_vm12 = vcmp.eq.s32.totalorder %v2268_v40, %v927_v50 }
 0x2fe   : > { %1629 = vmatprep.mubr.msk.f32.mxu1 %vm1043_vm11, %v1902_v16 }
 0x2ff   : > { %v943_v39 = vadd.s32 %v942_v27, %v940_v32  ;;  %1630 = vmatmul.mubr.msk.f32.gmra.mrb[18].mxu1 %vm1042_vm12, %v1902_v16 }
 0x300   : > { %v955_v57 = vpop.xlane.xlu1 %954 }
 0x301   : > { %1292 = vst.msk [vmem:[%s2519_s25 + $0x50] sm:$0xff] %vm1281_vm6, %v943_v39  ;;  %v956_v25 = vcvt.f32.s32 %v955_v57  ;;  %vm1045_vm13 = vcmp.eq.s32.totalorder %v2271_v42, %v943_v39  ;;  %vm1044_vm14 = vcmp.eq.s32.totalorder %v2268_v40, %v943_v39 }
 0x302   : > { %1631 = vmatprep.mubr.msk.f32.mxu1 %vm1045_vm13, %v1902_v16 }
 0x303   : > { %v959_v52 = vadd.s32 %v958_v21, %v956_v25  ;;  %1632 = vmatmul.mubr.msk.f32.gmra.mrb[20].mxu1 %vm1044_vm14, %v1902_v16 }
 0x304   : > { %v971_v44 = vpop.xlane.xlu0 %970 }
 0x305   : > { %1293 = vst.msk [vmem:[%s2519_s25 + $0x58] sm:$0xff] %vm1281_vm6, %v959_v52  ;;  %v972_v6 = vcvt.f32.s32 %v971_v44  ;;  %vm1047_vm15 = vcmp.eq.s32.totalorder %v2271_v42, %v959_v52  ;;  %vm1046_vm1 = vcmp.eq.s32.totalorder %v2268_v40, %v959_v52  ;;  %v1884_v52 = vld [vmem:[%s1995_s24 + $0x30] sm:$0xff] }
 0x306   : > { %1633 = vmatprep.mubr.msk.f32.mxu1 %vm1047_vm15, %v1902_v16 }
 0x307   : > { %v975_v11 = vadd.s32 %v974_v46, %v972_v6  ;;  %1634 = vmatmul.mubr.msk.f32.gmra.mrb[22].mxu1 %vm1046_vm1, %v1902_v16 }
 0x308   : > { %v987_v48 = vpop.xlane.xlu1 %986 }
 0x309   : > { %1294 = vst.msk [vmem:[%s2519_s25 + $0x60] sm:$0xff] %vm1281_vm6, %v975_v11  ;;  %v988_v37 = vcvt.f32.s32 %v987_v48  ;;  %vm1049_vm2 = vcmp.eq.s32.totalorder %v2271_v42, %v975_v11  ;;  %vm1048_vm3 = vcmp.eq.s32.totalorder %v2268_v40, %v975_v11  ;;  %v1885_v48 = vld [vmem:[%s1995_s24 + $0x38] sm:$0xff] }
 0x30a   : > { %1635 = vmatprep.mubr.msk.f32.mxu1 %vm1049_vm2, %v1902_v16 }
 0x30b   : > { %v991_v55 = vadd.s32 %v990_v58, %v988_v37  ;;  %1636 = vmatmul.mubr.msk.f32.gmra.mrb[24].mxu1 %vm1048_vm3, %v1902_v16 }
 0x30c   : > { %v1003_v47 = vpop.xlane.xlu0 %1002 }
 0x30d   : > { %1295 = vst.msk [vmem:[%s2519_s25 + $0x68] sm:$0xff] %vm1281_vm6, %v991_v55  ;;  %v1004_v51 = vcvt.f32.s32 %v1003_v47  ;;  %vm1051_vm4 = vcmp.eq.s32.totalorder %v2271_v42, %v991_v55  ;;  %vm1050_vm5 = vcmp.eq.s32.totalorder %v2268_v40, %v991_v55 }
 0x30e   : > { %1637 = vmatprep.mubr.msk.f32.mxu1 %vm1051_vm4, %v1902_v16 }
 0x30f   : > { %v1007_v62 = vadd.s32 %v1006_v26, %v1004_v51  ;;  %1638 = vmatmul.mubr.msk.f32.gmra.mrb[26].mxu1 %vm1050_vm5, %v1902_v16  ;;  %v1886_v51 = vld [vmem:[%s1995_s24 + $0x40] sm:$0xff] }
 0x310   : > { %v1019_v3 = vpop.xlane.xlu1 %1018 }
 0x311   : > { %1296 = vst.msk [vmem:[%s2519_s25 + $0x70] sm:$0xff] %vm1281_vm6, %v1007_v62  ;;  %v1020_v5 = vcvt.f32.s32 %v1019_v3  ;;  %vm1053_vm7 = vcmp.eq.s32.totalorder %v2271_v42, %v1007_v62  ;;  %vm1052_vm8 = vcmp.eq.s32.totalorder %v2268_v40, %v1007_v62 }
 0x312   : > { %1639 = vmatprep.mubr.msk.f32.mxu1 %vm1053_vm7, %v1902_v16 }
 0x313   : > { %v1023_v54 = vadd.s32 %v1022_v13, %v1020_v5  ;;  %1640 = vmatmul.mubr.msk.f32.gmra.mrb[28].mxu1 %vm1052_vm8, %v1902_v16 }
 0x315   : > { %1297 = vst.msk [vmem:[%s2519_s25 + $0x78] sm:$0xff] %vm1281_vm6, %v1023_v54  ;;  %vm1055_vm9 = vcmp.eq.s32.totalorder %v2271_v42, %v1023_v54  ;;  %vm1054_vm10 = vcmp.eq.s32.totalorder %v2268_v40, %v1023_v54  ;;  %v1878_v42 = vld [vmem:[%s1995_s24] sm:$0xff] }
 0x316   : > { %1641 = vmatprep.mubr.msk.f32.mxu1 %vm1055_vm9, %v1902_v16 }
 0x317   : > { %1642 = vmatmul.mubr.msk.f32.gmra.mrb[30].mxu1 %vm1054_vm10, %v1902_v16 }
 0x3ae   : > { %v1741_v59 = vpop.f32.mrb[0].mxu1 }
 0x3af   : > { %v1742_v31 = vpop.f32.mrb[1].mxu1 }
 0x3b0   : > { %v1743_v23 = vadd.f32 %v1742_v31, %v1741_v59  ;;  %v1887_v31 = vld [vmem:[%s1995_s24 + $0x48] sm:$0xff] }
 0x3b2   : > { %1265 = vst.msk [vmem:[%s2635_s28] sm:$0xff] %vm303_vm0, %v1743_v23  ;;  %v1298_v40 = vsub.f32 %v1743_v23, %v1878_v42  ;;  %v1744_v18 = vpop.f32.mrb[2].mxu1 }
 0x3b3   : > { %v1745_v12 = vpop.f32.mrb[3].mxu1 }
 0x3b4   : > { %v1746_v63 = vadd.f32 %v1745_v12, %v1744_v18  ;;  %v1314_v16 = vmul.f32 %v1298_v40, %v1298_v40 }
 0x3b6   : > { %1266 = vst.msk [vmem:[%s2635_s28 + $0x8] sm:$0xff] %vm303_vm0, %v1746_v63  ;;  %v1299_v30 = vsub.f32 %v1746_v63, %v1879_v35  ;;  %v1747_v36 = vpop.f32.mrb[4].mxu1  ;;  %v1330_v7 = vsel %vm303_vm0, %v1314_v16, 0.0  ;;  %v1888_v16 = vld [vmem:[%s1995_s24 + $0x50] sm:$0xff] }
 0x3b7   : > { %1331 = vadd.xlane.f32.xlu0 %v1330_v7  ;;  %v1748_v0 = vpop.f32.mrb[5].mxu1 }
 0x3b8   : > { %v1749_v43 = vadd.f32 %v1748_v0, %v1747_v36  ;;  %v1315_v20 = vmul.f32 %v1299_v30, %v1299_v30 }
 0x3ba   : > { %1267 = vst.msk [vmem:[%s2635_s28 + $0x10] sm:$0xff] %vm303_vm0, %v1749_v43  ;;  %v1300_v1 = vsub.f32 %v1749_v43, %v1880_v9  ;;  %v1750_v10 = vpop.f32.mrb[6].mxu1  ;;  %v1333_v41 = vsel %vm303_vm0, %v1315_v20, 0.0  ;;  %v1889_v20 = vld [vmem:[%s1995_s24 + $0x58] sm:$0xff] }
 0x3bb   : > { %1334 = vadd.xlane.f32.xlu1 %v1333_v41  ;;  %v1751_v53 = vpop.f32.mrb[7].mxu1 }
 0x3bc   : > { %v1752_v14 = vadd.f32 %v1751_v53, %v1750_v10  ;;  %v1316_v28 = vmul.f32 %v1300_v1, %v1300_v1 }
 0x3be   : > { %1268 = vst.msk [vmem:[%s2635_s28 + $0x18] sm:$0xff] %vm303_vm0, %v1752_v14  ;;  %v1301_v60 = vsub.f32 %v1752_v14, %v1881_v8  ;;  %v1753_v19 = vpop.f32.mrb[8].mxu1  ;;  %v1336_v45 = vsel %vm303_vm0, %v1316_v28, 0.0  ;;  %v1890_v28 = vld [vmem:[%s1995_s24 + $0x60] sm:$0xff] }
 0x3bf   : > { %1337 = vadd.xlane.f32.xlu0 %v1336_v45  ;;  %v1754_v4 = vpop.f32.mrb[9].mxu1 }
 0x3c0   : > { %v1755_v22 = vadd.f32 %v1754_v4, %v1753_v19  ;;  %v1317_v24 = vmul.f32 %v1301_v60, %v1301_v60 }
 0x3c2   : > { %1269 = vst.msk [vmem:[%s2635_s28 + $0x20] sm:$0xff] %vm303_vm0, %v1755_v22  ;;  %v1302_v15 = vsub.f32 %v1755_v22, %v1882_v49  ;;  %v1756_v29 = vpop.f32.mrb[10].mxu1  ;;  %v1339_v17 = vsel %vm303_vm0, %v1317_v24, 0.0  ;;  %v1891_v24 = vld [vmem:[%s1995_s24 + $0x68] sm:$0xff] }
 0x3c3   : > { %1340 = vadd.xlane.f32.xlu1 %v1339_v17  ;;  %v1757_v50 = vpop.f32.mrb[11].mxu1 }
 0x3c4   : > { %v1758_v27 = vadd.f32 %v1757_v50, %v1756_v29  ;;  %v1318_v34 = vmul.f32 %v1302_v15, %v1302_v15 }
 0x3c6   : > { %1270 = vst.msk [vmem:[%s2635_s28 + $0x28] sm:$0xff] %vm303_vm0, %v1758_v27  ;;  %v1303_v32 = vsub.f32 %v1758_v27, %v1883_v56  ;;  %v1759_v39 = vpop.f32.mrb[12].mxu1  ;;  %v1342_v38 = vsel %vm303_vm0, %v1318_v34, 0.0  ;;  %v1892_v34 = vld [vmem:[%s1995_s24 + $0x70] sm:$0xff] }
 0x3c7   : > { %1343 = vadd.xlane.f32.xlu0 %v1342_v38  ;;  %v1760_v57 = vpop.f32.mrb[13].mxu1 }
 0x3c8   : > { %v1761_v21 = vadd.f32 %v1760_v57, %v1759_v39  ;;  %v1319_v25 = vmul.f32 %v1303_v32, %v1303_v32 }
 0x3ca   : > { %1271 = vst.msk [vmem:[%s2635_s28 + $0x30] sm:$0xff] %vm303_vm0, %v1761_v21  ;;  %v1304_v46 = vsub.f32 %v1761_v21, %v1884_v52  ;;  %v1762_v44 = vpop.f32.mrb[14].mxu1  ;;  %v1345_v33 = vsel %vm303_vm0, %v1319_v25, 0.0  ;;  %v1893_v25 = vld [vmem:[%s1995_s24 + $0x78] sm:$0xff] }
 0x3cb   : > { %1346 = vadd.xlane.f32.xlu1 %v1345_v33  ;;  %v1763_v6 = vpop.f32.mrb[15].mxu1 }
 0x3cc   : > { %v1764_v11 = vadd.f32 %v1763_v6, %v1762_v44  ;;  %v1320_v61 = vmul.f32 %v1304_v46, %v1304_v46 }
 0x3ce   : > { %1272 = vst.msk [vmem:[%s2635_s28 + $0x38] sm:$0xff] %vm303_vm0, %v1764_v11  ;;  %v1305_v58 = vsub.f32 %v1764_v11, %v1885_v48  ;;  %v1765_v37 = vpop.f32.mrb[16].mxu1  ;;  %v1348_v55 = vsel %vm303_vm0, %v1320_v61, 0.0 }
 0x3cf   : > { %1349 = vadd.xlane.f32.xlu0 %v1348_v55  ;;  %v1766_v26 = vpop.f32.mrb[17].mxu1 }
 0x3d0   : > { %v1767_v47 = vadd.f32 %v1766_v26, %v1765_v37  ;;  %v1321_v2 = vmul.f32 %v1305_v58, %v1305_v58 }
 0x3d2   : > { %1273 = vst.msk [vmem:[%s2635_s28 + $0x40] sm:$0xff] %vm303_vm0, %v1767_v47  ;;  %v1306_v62 = vsub.f32 %v1767_v47, %v1886_v51  ;;  %v1768_v3 = vpop.f32.mrb[18].mxu1  ;;  %v1351_v13 = vsel %vm303_vm0, %v1321_v2, 0.0 }
 0x3d3   : > { %1352 = vadd.xlane.f32.xlu1 %v1351_v13  ;;  %v1769_v5 = vpop.f32.mrb[19].mxu1 }
 0x3d4   : > { %v1770_v54 = vadd.f32 %v1769_v5, %v1768_v3  ;;  %v1322_v59 = vmul.f32 %v1306_v62, %v1306_v62 }
 0x3d6   : > { %1274 = vst.msk [vmem:[%s2635_s28 + $0x48] sm:$0xff] %vm303_vm0, %v1770_v54  ;;  %v1307_v23 = vsub.f32 %v1770_v54, %v1887_v31  ;;  %v1771_v42 = vpop.f32.mrb[20].mxu1  ;;  %v1354_v40 = vsel %vm303_vm0, %v1322_v59, 0.0 }
 0x3d7   : > { %1355 = vadd.xlane.f32.xlu0 %v1354_v40  ;;  %v1772_v18 = vpop.f32.mrb[21].mxu1 }
 0x3d8   : > { %v1773_v12 = vadd.f32 %v1772_v18, %v1771_v42  ;;  %v1323_v63 = vmul.f32 %v1307_v23, %v1307_v23 }
 0x3da   : > { %1275 = vst.msk [vmem:[%s2635_s28 + $0x50] sm:$0xff] %vm303_vm0, %v1773_v12  ;;  %v1308_v35 = vsub.f32 %v1773_v12, %v1888_v16  ;;  %v1774_v30 = vpop.f32.mrb[22].mxu1  ;;  %v1357_v36 = vsel %vm303_vm0, %v1323_v63, 0.0 }
 0x3db   : > { %1358 = vadd.xlane.f32.xlu1 %v1357_v36  ;;  %v1775_v7 = vpop.f32.mrb[23].mxu1 }
 0x3dc   : > { %v1776_v0 = vadd.f32 %v1775_v7, %v1774_v30  ;;  %v1324_v43 = vmul.f32 %v1308_v35, %v1308_v35 }
 0x3de   : > { %1276 = vst.msk [vmem:[%s2635_s28 + $0x58] sm:$0xff] %vm303_vm0, %v1776_v0  ;;  %v1309_v9 = vsub.f32 %v1776_v0, %v1889_v20  ;;  %v1777_v1 = vpop.f32.mrb[24].mxu1  ;;  %v1360_v10 = vsel %vm303_vm0, %v1324_v43, 0.0 }
 0x3df   : > { %1361 = vadd.xlane.f32.xlu0 %v1360_v10  ;;  %v1778_v41 = vpop.f32.mrb[25].mxu1 }
 0x3e0   : > { %v1779_v53 = vadd.f32 %v1778_v41, %v1777_v1  ;;  %v1325_v14 = vmul.f32 %v1309_v9, %v1309_v9 }
 0x3e2   : > { %1277 = vst.msk [vmem:[%s2635_s28 + $0x60] sm:$0xff] %vm303_vm0, %v1779_v53  ;;  %v1310_v8 = vsub.f32 %v1779_v53, %v1890_v28  ;;  %v1780_v60 = vpop.f32.mrb[26].mxu1  ;;  %v1363_v19 = vsel %vm303_vm0, %v1325_v14, 0.0 }
 0x3e3   : > { %1364 = vadd.xlane.f32.xlu1 %v1363_v19  ;;  %v1781_v45 = vpop.f32.mrb[27].mxu1 }
 0x3e4   : > { %v1782_v4 = vadd.f32 %v1781_v45, %v1780_v60  ;;  %v1326_v22 = vmul.f32 %v1310_v8, %v1310_v8 }
 0x3e6   : > { %1278 = vst.msk [vmem:[%s2635_s28 + $0x68] sm:$0xff] %vm303_vm0, %v1782_v4  ;;  %v1311_v49 = vsub.f32 %v1782_v4, %v1891_v24  ;;  %v1783_v15 = vpop.f32.mrb[28].mxu1  ;;  %v1366_v29 = vsel %vm303_vm0, %v1326_v22, 0.0 }
 0x3e7   : > { %1367 = vadd.xlane.f32.xlu0 %v1366_v29  ;;  %v1784_v17 = vpop.f32.mrb[29].mxu1 }
 0x3e8   : > { %v1785_v50 = vadd.f32 %v1784_v17, %v1783_v15  ;;  %v1327_v27 = vmul.f32 %v1311_v49, %v1311_v49 }
 0x3ea   : > { %1279 = vst.msk [vmem:[%s2635_s28 + $0x70] sm:$0xff] %vm303_vm0, %v1785_v50  ;;  %v1312_v56 = vsub.f32 %v1785_v50, %v1892_v34  ;;  %v1786_v32 = vpop.f32.mrb[30].mxu1  ;;  %v1369_v39 = vsel %vm303_vm0, %v1327_v27, 0.0 }
 0x3eb   : > { %1370 = vadd.xlane.f32.xlu1 %v1369_v39  ;;  %v1787_v38 = vpop.f32.mrb[31].mxu1 }
 0x3ec   : > { %v1788_v57 = vadd.f32 %v1787_v38, %v1786_v32  ;;  %v1328_v21 = vmul.f32 %v1312_v56, %v1312_v56 }
 0x3ee   : > { %1280 = vst.msk [vmem:[%s2635_s28 + $0x78] sm:$0xff] %vm303_vm0, %v1788_v57  ;;  %v1313_v52 = vsub.f32 %v1788_v57, %v1893_v25  ;;  %v1372_v46 = vsel %vm303_vm0, %v1328_v21, 0.0 }
 0x3ef   : > { %1373 = vadd.xlane.f32.xlu0 %v1372_v46 }
 0x3f0   : > { %v1329_v44 = vmul.f32 %v1313_v52, %v1313_v52 }
 0x3f2   : > { %v1375_v33 = vsel %vm303_vm0, %v1329_v44, 0.0 }
 0x3f3   : > { %1376 = vadd.xlane.f32.xlu1 %v1375_v33 }
 0x444   : > { %v1332_v6 = vpop.xlane.xlu0 %1331 }
 0x445   : > { %1378 = vst.msk [vmem:[%s2705_s6] sm:$0xff] %vm1281_vm6, %v1332_v6 }
 0x448   : > { %v1335_v11 = vpop.xlane.xlu1 %1334 }
 0x449   : > { %1379 = vst.msk [vmem:[%s2705_s6 + $0x8] sm:$0xff] %vm1281_vm6, %v1335_v11 }
 0x44c   : > { %v1338_v61 = vpop.xlane.xlu0 %1337 }
 0x44d   : > { %1380 = vst.msk [vmem:[%s2705_s6 + $0x10] sm:$0xff] %vm1281_vm6, %v1338_v61 }
 0x450   : > { %v1341_v48 = vpop.xlane.xlu1 %1340 }
 0x451   : > { %1381 = vst.msk [vmem:[%s2705_s6 + $0x18] sm:$0xff] %vm1281_vm6, %v1341_v48 }
 0x454   : > { %v1344_v58 = vpop.xlane.xlu0 %1343 }
 0x455   : > { %1382 = vst.msk [vmem:[%s2705_s6 + $0x20] sm:$0xff] %vm1281_vm6, %v1344_v58 }
 0x458   : > { %v1347_v37 = vpop.xlane.xlu1 %1346 }
 0x459   : > { %1383 = vst.msk [vmem:[%s2705_s6 + $0x28] sm:$0xff] %vm1281_vm6, %v1347_v37 }
 0x45c   : > { %v1350_v55 = vpop.xlane.xlu0 %1349 }
 0x45d   : > { %1384 = vst.msk [vmem:[%s2705_s6 + $0x30] sm:$0xff] %vm1281_vm6, %v1350_v55 }
 0x460   : > { %v1353_v26 = vpop.xlane.xlu1 %1352 }
 0x461   : > { %1385 = vst.msk [vmem:[%s2705_s6 + $0x38] sm:$0xff] %vm1281_vm6, %v1353_v26 }
 0x464   : > { %v1356_v47 = vpop.xlane.xlu0 %1355 }
 0x465   : > { %1386 = vst.msk [vmem:[%s2705_s6 + $0x40] sm:$0xff] %vm1281_vm6, %v1356_v47 }
 0x468   : > { %v1359_v2 = vpop.xlane.xlu1 %1358 }
 0x469   : > { %1387 = vst.msk [vmem:[%s2705_s6 + $0x48] sm:$0xff] %vm1281_vm6, %v1359_v2 }
 0x46c   : > { %v1362_v51 = vpop.xlane.xlu0 %1361 }
 0x46d   : > { %1388 = vst.msk [vmem:[%s2705_s6 + $0x50] sm:$0xff] %vm1281_vm6, %v1362_v51 }
 0x470   : > { %v1365_v62 = vpop.xlane.xlu1 %1364 }
 0x471   : > { %1389 = vst.msk [vmem:[%s2705_s6 + $0x58] sm:$0xff] %vm1281_vm6, %v1365_v62 }
 0x474   : > { %v1368_v3 = vpop.xlane.xlu0 %1367 }
 0x475   : > { %1390 = vst.msk [vmem:[%s2705_s6 + $0x60] sm:$0xff] %vm1281_vm6, %v1368_v3 }
 0x478   : > { %v1371_v13 = vpop.xlane.xlu1 %1370 }
 0x479   : > { %1391 = vst.msk [vmem:[%s2705_s6 + $0x68] sm:$0xff] %vm1281_vm6, %v1371_v13 }
 0x47c   : > { %v1374_v5 = vpop.xlane.xlu0 %1373 }
 0x47d   : > { %1392 = vst.msk [vmem:[%s2705_s6 + $0x70] sm:$0xff] %vm1281_vm6, %v1374_v5 }
 0x480   : > { %v1377_v54 = vpop.xlane.xlu1 %1376 }
 0x481   : > { %1393 = vst.msk [vmem:[%s2705_s6 + $0x78] sm:$0xff] %vm1281_vm6, %v1377_v54 }
 0x482 PF: > { %s16_s18 = sadd.s32 1, %s1900_s18  }
 0x483   : > { %p13_p4 = scmp.ge.s32.totalorder %s16_s18, 4  }
 0x485   :  { %15 = sbr.rel (!%p13_p4) target bundleno = 1 (0x1), region = 86 }

</bundles_post_ra>
